<compile_context>
chip_gen: v5e
topology: v5e:2x2
jax: 0.10.0
libtpu: 0.0.40
codegen_flags: <defaults>
</compile_context>

<pallas_src>
import jax
import jax.numpy as jnp
from jax.experimental import pallas as pl
from jax.experimental.pallas import tpu as pltpu

CLAMP_MIN = 0.8
CLAMP_MAX = 1.9

C_IN = 255
KHW = 64
K_TOTAL = C_IN * KHW * KHW              # 1_044_480
LANES = 128
SUBLANES = 8
K_GROUPS = K_TOTAL // (SUBLANES * LANES)  # 1020 (8,128) vreg tiles along K
GRID_K = 4                                # 4 grid steps over K
TKG = K_GROUPS // GRID_K                  # 255 tiles per step


def _conv_clamp_kernel(bias_ref, x_ref, w_ref, o_ref, acc_ref):
    k = pl.program_id(0)

    @pl.when(k == 0)
    def _():
        acc_ref[...] = jnp.zeros_like(acc_ref)

    # x_ref: (N, TKG, 8, 128); w_ref: (TKG, 8, 128).
    # Lane-dense VPU multiply + cross-vreg add into a wide (N, 8, 128) accumulator.
    acc_ref[...] += jnp.sum(x_ref[...] * w_ref[...], axis=1)

    @pl.when(k == pl.num_programs(0) - 1)
    def _():
        acc = acc_ref[...]                          # (N, 8, 128)
        red = jnp.sum(acc, axis=1)                  # sublane reduce -> (N, 128)
        red = jnp.sum(red, axis=1, keepdims=True)   # lane reduce    -> (N, 1)
        v = red + bias_ref[0]
        o_ref[...] = jnp.clip(v, CLAMP_MIN, CLAMP_MAX).astype(o_ref.dtype)


def conv_clamp(x, weight, bias):
    """x: (N, 255, 64, 64) f32; weight: (1, 255, 64, 64); bias: (1,) -> (N, 1, 1, 1)."""
    n = x.shape[0]
    assert x.shape[1:] == (C_IN, KHW, KHW), "only full-kernel (1x1 output) case"

    # Contiguous (free) reshapes to lane-dense tiled layouts.
    x_t = x.reshape(n, K_GROUPS, SUBLANES, LANES)
    w_t = weight.reshape(K_GROUPS, SUBLANES, LANES)

    out = pl.pallas_call(
        _conv_clamp_kernel,
        out_shape=jax.ShapeDtypeStruct((n, 1), jnp.float32),
        grid_spec=pltpu.PrefetchScalarGridSpec(
            num_scalar_prefetch=1,                  # bias -> SMEM
            grid=(GRID_K,),
            in_specs=[
                pl.BlockSpec((n, TKG, SUBLANES, LANES), lambda k, b: (0, k, 0, 0)),
                pl.BlockSpec((TKG, SUBLANES, LANES), lambda k, b: (k, 0, 0)),
            ],
            out_specs=pl.BlockSpec((n, 1), lambda k, b: (0, 0)),
            scratch_shapes=[pltpu.VMEM((n, SUBLANES, LANES), jnp.float32)],
        ),
        compiler_params=pltpu.CompilerParams(
            dimension_semantics=("arbitrary",),     # K is a reduction axis
            vmem_limit_bytes=32 * 1024 * 1024,
        ),
    )(bias, x_t, w_t)

    return out.reshape(n, 1, 1, 1)


if __name__ == "__main__":
    key = jax.random.PRNGKey(0)
    kx, kw, kb = jax.random.split(key, 3)

    N = 2  # minimal valid input for Conv2d(255, 1, 64): (N, 255, 64, 64)
    x = jax.random.normal(kx, (N, C_IN, KHW, KHW), dtype=jnp.float32)
    # Deterministic synthetic "Conv2d(255, 1, 64)" parameters.
    fan_in = C_IN * KHW * KHW
    bound = 1.0 / (fan_in ** 0.5)
    weight = jax.random.uniform(kw, (1, C_IN, KHW, KHW), jnp.float32, -bound, bound)
    bias = jax.random.uniform(kb, (1,), jnp.float32, -bound, bound)

    out = conv_clamp(x, weight, bias)
    out = jax.block_until_ready(out)

    # Reference: full-extent VALID conv == flattened dot product, then clamp.
    ref_dot = jnp.einsum(
        "nk,k->n",
        x.reshape(N, -1),
        weight.reshape(-1),
        precision=jax.lax.Precision.HIGHEST,
    )
    ref = jnp.clip(ref_dot + bias[0], CLAMP_MIN, CLAMP_MAX).reshape(N, 1, 1, 1)

    assert out.shape == (N, 1, 1, 1)
    assert jnp.allclose(out, ref, rtol=2e-3, atol=2e-3)

    print("KERNEL_OK")
</pallas_src>

<mosaic_0001>
module attributes {stable_mosaic.version = 11 : i64} {
  func.func @_conv_clamp_kernel(%arg0: i32, %arg1: memref<1xf32, #tpu.memory_space<smem>>, %arg2: memref<2x255x8x128xf32, #tpu.memory_space<vmem>>, %arg3: memref<255x8x128xf32, #tpu.memory_space<vmem>>, %arg4: memref<2x1xf32, #tpu.memory_space<vmem>>, %arg5: memref<2x8x128xf32, #tpu.memory_space<vmem>>) attributes {dimension_semantics = [#tpu.dimension_semantics<arbitrary>], iteration_bounds = array<i64: 4>, scalar_prefetch = 1 : i64, scratch_operands = 1 : i64, tpu.core_type = #tpu.core_type<tc>, window_params = [{transform_indices = @transform_0, window_bounds = array<i64: 2, 255, 8, 128>}, {transform_indices = @transform_1, window_bounds = array<i64: 255, 8, 128>}, {pipeline_mode = #tpu.pipeline_mode<synchronous>, transform_indices = @transform_2, window_bounds = array<i64: 2, 1>}]} {
    %c0_i32 = arith.constant 0 : i32
    %0 = arith.cmpi eq, %arg0, %c0_i32 : i32
    %1 = arith.extui %0 : i1 to i32
    %c0_i32_0 = arith.constant 0 : i32
    %2 = arith.cmpi ne, %1, %c0_i32_0 : i32
    scf.if %2 {
      %cst_14 = arith.constant 0.000000e+00 : f32
      %15 = vector.broadcast %cst_14 : f32 to vector<2x8x128xf32>
      %c0_15 = arith.constant 0 : index
      %c0_16 = arith.constant 0 : index
      %c0_17 = arith.constant 0 : index
      %16 = vector.load %arg5[%c0_15, %c0_16, %c0_17] : memref<2x8x128xf32, #tpu.memory_space<vmem>>, vector<2x8x128xf32>
      tpu.vector_store %arg5[%c0_15, %c0_16, %c0_17], %15 {strides = array<i32>} : memref<2x8x128xf32, #tpu.memory_space<vmem>>, vector<2x8x128xf32>,
    } else {
    }
    %c0 = arith.constant 0 : index
    %c0_1 = arith.constant 0 : index
    %c0_2 = arith.constant 0 : index
    %3 = vector.load %arg5[%c0, %c0_1, %c0_2] : memref<2x8x128xf32, #tpu.memory_space<vmem>>, vector<2x8x128xf32>
    %c0_3 = arith.constant 0 : index
    %c0_4 = arith.constant 0 : index
    %c0_5 = arith.constant 0 : index
    %c0_6 = arith.constant 0 : index
    %4 = vector.load %arg2[%c0_3, %c0_4, %c0_5, %c0_6] : memref<2x255x8x128xf32, #tpu.memory_space<vmem>>, vector<2x255x8x128xf32>
    %c0_7 = arith.constant 0 : index
    %c0_8 = arith.constant 0 : index
    %c0_9 = arith.constant 0 : index
    %5 = vector.load %arg3[%c0_7, %c0_8, %c0_9] : memref<255x8x128xf32, #tpu.memory_space<vmem>>, vector<255x8x128xf32>
    %6 = vector.shape_cast %5 : vector<255x8x128xf32> to vector<1x255x8x128xf32>
    %7 = vector.broadcast %6 : vector<1x255x8x128xf32> to vector<2x255x8x128xf32>
    %8 = arith.mulf %4, %7 : vector<2x255x8x128xf32>
    %cst = arith.constant dense<0.000000e+00> : vector<2x8x128xf32>
    %9 = vector.multi_reduction <add>, %8, %cst [1] : vector<2x255x8x128xf32> to vector<2x8x128xf32>
    %10 = arith.addf %3, %9 : vector<2x8x128xf32>
    %c0_10 = arith.constant 0 : index
    %c0_11 = arith.constant 0 : index
    %c0_12 = arith.constant 0 : index
    %11 = vector.load %arg5[%c0_10, %c0_11, %c0_12] : memref<2x8x128xf32, #tpu.memory_space<vmem>>, vector<2x8x128xf32>
    tpu.vector_store %arg5[%c0_10, %c0_11, %c0_12], %10 {strides = array<i32>} : memref<2x8x128xf32, #tpu.memory_space<vmem>>, vector<2x8x128xf32>,
    %c3_i32 = arith.constant 3 : i32
    %12 = arith.cmpi eq, %arg0, %c3_i32 : i32
    %13 = arith.extui %12 : i1 to i32
    %c0_i32_13 = arith.constant 0 : i32
    %14 = arith.cmpi ne, %13, %c0_i32_13 : i32
    scf.if %14 {
      %c0_14 = arith.constant 0 : index
      %c0_15 = arith.constant 0 : index
      %c0_16 = arith.constant 0 : index
      %15 = vector.load %arg5[%c0_14, %c0_15, %c0_16] : memref<2x8x128xf32, #tpu.memory_space<vmem>>, vector<2x8x128xf32>
      %cst_17 = arith.constant dense<0.000000e+00> : vector<2x128xf32>
      %16 = vector.multi_reduction <add>, %15, %cst_17 [1] : vector<2x8x128xf32> to vector<2x128xf32>
      %cst_18 = arith.constant dense<0.000000e+00> : vector<2xf32>
      %17 = vector.multi_reduction <add>, %16, %cst_18 [1] : vector<2x128xf32> to vector<2xf32>
      %18 = vector.shape_cast %17 : vector<2xf32> to vector<2x1xf32>
      %c0_19 = arith.constant 0 : index
      %19 = memref.load %arg1[%c0_19] : memref<1xf32, #tpu.memory_space<smem>>
      %20 = vector.broadcast %19 : f32 to vector<2x1xf32>
      %21 = arith.addf %18, %20 : vector<2x1xf32>
      %cst_20 = arith.constant 8.000000e-01 : f32
      %cst_21 = arith.constant 1.900000e+00 : f32
      %22 = vector.broadcast %cst_20 : f32 to vector<2x1xf32>
      %23 = arith.maximumf %22, %21 : vector<2x1xf32>
      %24 = vector.broadcast %cst_21 : f32 to vector<2x1xf32>
      %25 = arith.minimumf %24, %23 : vector<2x1xf32>
      %c0_22 = arith.constant 0 : index
      %c0_23 = arith.constant 0 : index
      %26 = vector.load %arg4[%c0_22, %c0_23] : memref<2x1xf32, #tpu.memory_space<vmem>>, vector<2x1xf32>
      tpu.vector_store %arg4[%c0_22, %c0_23], %25 {strides = array<i32>} : memref<2x1xf32, #tpu.memory_space<vmem>>, vector<2x1xf32>,
    } else {
    }
    return
  }
  func.func @transform_0(%arg0: i32, %arg1: memref<1xf32, #tpu.memory_space<smem>>) -> (i32, i32, i32, i32) {
    %c0_i32 = arith.constant 0 : i32
    %c0_i32_0 = arith.constant 0 : i32
    %c0_i32_1 = arith.constant 0 : i32
    %c0_i32_2 = arith.constant 0 : i32
    return %c0_i32, %arg0, %c0_i32_0, %c0_i32_1 : i32, i32, i32, i32
  }
  func.func @transform_1(%arg0: i32, %arg1: memref<1xf32, #tpu.memory_space<smem>>) -> (i32, i32, i32) {
    %c0_i32 = arith.constant 0 : i32
    %c0_i32_0 = arith.constant 0 : i32
    %c0_i32_1 = arith.constant 0 : i32
    return %arg0, %c0_i32, %c0_i32_0 : i32, i32, i32
  }
  func.func @transform_2(%arg0: i32, %arg1: memref<1xf32, #tpu.memory_space<smem>>) -> (i32, i32) {
    %c0_i32 = arith.constant 0 : i32
    %c0_i32_0 = arith.constant 0 : i32
    %c0_i32_1 = arith.constant 0 : i32
    return %c0_i32, %c0_i32_0 : i32, i32
  }
}

</mosaic_0001>

<bundles_post_ra>
// kernel: tpu_custom_call.1
= control target key start
LH: loop header
LB: loop body
LE: loop exit
PB: predicated region body
PF: predicated region fallthrough
CT: control target
= control target key end

     0   :  { %s4189_s0 = inlined_call_operand.<no memory space> [shape: f32[1], index: 0, kind: input, shape index: {}]   ;;  %s4190_s1 = inlined_call_operand.hbm [shape: f32[2,1020,8,128], index: 1, kind: input, shape index: {}]   ;;  %s4191_s2 = inlined_call_operand.hbm [shape: f32[1020,8,128], index: 2, kind: input, shape index: {}]   ;;  %s4192_s3 = inlined_call_operand.vmem [shape: f32[2,1], index: 3, kind: output, shape index: {}]  }
   0x1   :  { %8 = sst [smem:[#allocation4]] %s4189_s0 }
   0x2   :  { %9 = vsyncpa [#allocation6], 0 }
   0x3   :  { %11 = vsyncpa [#allocation6 + $0x1], 0 }
   0x4   :  { %12 = vsyncpa [#allocation8], 0 }
   0x5   :  { %14 = vsyncpa [#allocation8 + $0x1], 0  ;;  %s2283_s14 = smov 0   ;;  %s2285_s15 = smov 0  }
   0x6   :  { %s2287_s16 = smov 0   ;;  %s2289_s17 = smov 0  }
   0x7 LB: > { %s2302_s0 = sadd.s32 4294967295, %s2249_s17   ;;  %s2305_s18 = sadd.s32 1, %s2249_s17   ;;  %s2249_s17 = sphi %s2289_s17, %s4198_s17   ;;  %s2245_s16 = sphi %s2287_s16, %s4197_s16   ;;  %s2241_s15 = sphi %s2285_s15, %s4196_s15   ;;  %s2237_s14 = sphi %s2283_s14, %s4195_s14  }
   0x8   : > { %s24_s19 = ssub.s32 %s2249_s17, %s2305_s18  ;;  %s27_s20 = sadd.s32 1, %s2245_s16 }
   0x9   : > { %p25_p0 = scmp.eq.s32.totalorder %s24_s19, 0  ;;  %p34_p1 = scmp.ne.s32.totalorder %s2245_s16, %s2241_s15 }
   0xa   : > { %p35_p2 = scmp.eq.s32.totalorder %s2249_s17, 0  ;;  %p40_p3 = scmp.ne.s32.totalorder %s2241_s15, %s2237_s14 }
   0xb   : > { %s2315_s21 = scalar_select %p25_p0, %s2245_s16, %s27_s20  }
   0xc   : > { %p2317_p4 = por %p35_p2, %p34_p1  ;;  %p41_p5 = scmp.eq.s32.totalorder %s2302_s0, 0 }
   0xd   : > { %p2115_p7 = scmp.ge.s32.totalorder %s2249_s17, 4 }
   0xe   : > { %p2322_p6 = por %p41_p5, %p40_p3 }
   0xf   : > { %107 = sbr.rel (%p2115_p7) target bundleno = 49 (0x31), region = 16 }
  0x14   : > { %s2328_s24 = sand.u32 1, %s2245_s16   ;;  %s2125_s25 = smul.u32 2040, %s2249_s17 }
  0x15   : > { %s2127_s26 = smul.u32 4080, %s2328_s24  ;;  %s2251_s8 = smov 130560  }
  0x16   : > { %s120_s29 = scalar_lea.hbm %s4190_s1, %s2125_s25  ;;  %2132 = sst [smem:[#allocation10]] (%p2317_p4), %s2251_s8 }
  0x17   : > { %s133_s30 = sshll.u32 %s120_s29, 4  ;;  %s115_s5 = scalar_lea.vmem [#allocation5], %s2127_s26  ;;  %s134_s30 = int_to_ptr.hbm [resolvable:$true] %s133_s30 }
  0x18   : > { %s2131_s4 = scalar_select %p2317_p4, [#allocation0], [#allocation11] }
  0x19   : > { %s135_s6 = sshll.u32 %s115_s5, 4  ;;  %s2252_s9 = smov 32640   ;;  %s136_s6 = int_to_ptr.vmem [resolvable:$true] %s135_s6 }
  0x1a   : > { %s125_s7 = sld [smem:[%s2131_s4]]   ;;  %s2253_s10 = smov 255  }
  0x1b   : > { %2133 = sst [smem:[#allocation10 + $0x1]] (%p2317_p4), %s2252_s9  ;;  %s2254_s11 = smov 128  }
  0x1c   : > { %2134 = sst [smem:[#allocation10 + $0x2]] (%p2317_p4), %s2253_s10  ;;  %s2255_s13 = smov 8  }
  0x1d   : > { %2135 = sst [smem:[#allocation10 + $0x3]] (%p2317_p4), %s2254_s11  ;;  %s112_s19 = scalar_lea.sflag [#allocation6], %s2328_s24 }
  0x1e   : > { %2136 = sst [smem:[#allocation10 + $0x4]] (%p2317_p4), %s2254_s11  ;;  %s2256_s20 = smov [#allocation9]  }
  0x1f   : > { %2137 = sst [smem:[#allocation10 + $0x5]] (%p2317_p4), %s2255_s13  ;;  %s2128_s26 = smul.u32 2040, %s2328_s24 }
  0x20   : > { %s2117_s12 = sshll.u32 %s125_s7, 26  ;;  %s167_s29 = scalar_lea.hbm %s4191_s2, %s2125_s25 }
  0x21   : > { %s2118_s14 = sadd.s32 134217728, %s2117_s12  ;;  %s168_s4 = sshll.u32 %s167_s29, 4  ;;  %s169_s4 = int_to_ptr.hbm [resolvable:$true] %s168_s4 }
  0x22   : > { %2138 = dma.general (%p2317_p4), %s134_s30, 65280, %s136_s6, %s112_s19, %s2256_s20, [#allocation10], %s2118_s14, 0  }
  0x23   : > { %s162_s5 = scalar_lea.vmem [#allocation7], %s2128_s26  ;;  %s159_s8 = scalar_lea.sflag [#allocation8], %s2328_s24 }
  0x24   : > { %s170_s7 = sshll.u32 %s162_s5, 4  ;;  %s2183_s9 = sshra.s32 %s169_s4, 4  ;;  %s171_s7 = int_to_ptr.vmem [resolvable:$true] %s170_s7  ;;  %s2184_s9 = int_to_ptr.hbm [resolvable:$true] %s2183_s9 }
  0x25   : > { %s2185_s10 = scalar_lea.hbm %s2184_s9, 2040  ;;  %s2189_s11 = scalar_lea.hbm %s4191_s2, 8160 }
  0x26   : > { %p2186_p8 = scmp.ne.s32.totalorder %s2184_s9, %s2185_s10  ;;  %p2190_p11 = scmp.lt.s32.totalorder %s2184_s9, %s4191_s2 }
  0x27   : > { %p2191_p12 = scmp.lt.s32.totalorder %s2189_s11, %s2185_s10 }
  0x28   : > { %p2187_p9 = pnand %p2186_p8, %p2317_p4 }
  0x29   : > { %p2192_p13 = por %p2191_p12, %p2190_p11 }
  0x2a   : > { %p2188_p10 = pneg %p2187_p9 }
  0x2c   : > { %p2193_p0 = pnand %p2192_p13, %p2188_p10 }
  0x2e   : > { %2196 = shalt.err (!%p2193_p0)
}
  0x2f   : > { %s2257_s24 = smov 128   ;;  %s2258_s25 = smov 8  }
  0x30   : > { %2139 = dma.hbm_to_vmem [thread:$0]  (%p2317_p4), %s169_s4, 32640, %s171_s7, %s159_s8, %s2257_s24, %s2257_s24, %s2258_s25  }
  0x31 PF: > { %p2120_p1 = scmp.ge.s32.totalorder %s2249_s17, 1  ;;  %p178_p2 = scmp.lt.s32.totalorder %s2249_s17, 5 }
  0x33   : > { %p179_p3 = pnand %p2120_p1, %p178_p2 }
  0x34   : > { %s184_s14 = sand.u32 (!%p179_p3), 1, %s2241_s15  }
  0x35   : > { %182 = sbr.rel (%p179_p3) target bundleno = 762 (0x2fa), region = 28  ;;  %s185_s20 = scalar_lea.sflag (!%p179_p3), [#allocation6], %s184_s14 }
  0x36   : > { %s2129_s19 = smul.u32 (!%p179_p3), 4080, %s184_s14 }
  0x38   : > { %s2374_s26 = scalar_lea.vmem (!%p179_p3), [#allocation5], %s2129_s19 }
  0x3a   : > { %2228 = dma.done.wait (%p2322_p6), %s185_s20, 65280  }
  0x3b   : > { %2230 = vsyncadd (%p2322_p6), %s185_s20, 4294902016  ;;  %s2130_s22 = smul.u32 2040, %s184_s14  ;;  %s195_s27 = scalar_lea.sflag [#allocation8], %s184_s14 }
  0x3d   : > { %s2380_s28 = scalar_lea.vmem [#allocation7], %s2130_s22 }
  0x3e   : > { %2232 = dma.done.wait (%p2322_p6), %s195_s27, 32640  }
  0x3f   : > { %2234 = vsyncadd (%p2322_p6), %s195_s27, 4294934656  ;;  %p2121_p4 = scmp.ne.s32.totalorder %s2302_s0, 0 }
  0x41   : > { %225 = sbr.rel (%p2121_p4) target bundleno = 73 (0x49), region = 40 }
  0x46   : > { %v2259_v0 = vmov 0.0  }
  0x47   : > { %226 = vst [vmem:[#allocation2] sm:$0xff] %v2259_v0 }
  0x48   : > { %227 = vst [vmem:[#allocation2 + $0x8] sm:$0xff] %v2259_v0 }
  0x49 PF: > { %v230_v1 = vld [vmem:[%s2374_s26] sm:$0xff]  ;;  %v231_v2 = vld [vmem:[%s2374_s26 + $0x8] sm:$0xff]  ;;  %v232_v7 = vld [vmem:[%s2374_s26 + $0x10] sm:$0xff]  ;;  %p2122_p5 = scmp.ne.s32.totalorder %s2302_s0, 3 }
  0x4a   : > { %v2390_v3 = vld [vmem:[%s2380_s28] sm:$0xff]  ;;  %v2393_v4 = vld [vmem:[%s2380_s28 + $0x8] sm:$0xff]  ;;  %v2399_v8 = vld [vmem:[%s2380_s28 + $0x10] sm:$0xff]  ;;  %s2044_s17 = sld [smem:[#allocation4]] (!%p2122_p5) }
  0x4b   : > { %v995_v5 = vmul.f32 %v2390_v3, %v230_v1  ;;  %v996_v6 = vmul.f32 %v2393_v4, %v231_v2  ;;  %v997_v9 = vmul.f32 %v2399_v8, %v232_v7  ;;  %v233_v11 = vld [vmem:[%s2374_s26 + $0x18] sm:$0xff]  ;;  %v234_v15 = vld [vmem:[%s2374_s26 + $0x20] sm:$0xff]  ;;  %v235_v19 = vld [vmem:[%s2374_s26 + $0x28] sm:$0xff] }
  0x4c   : > { %v2404_v12 = vld [vmem:[%s2380_s28 + $0x18] sm:$0xff]  ;;  %v2409_v16 = vld [vmem:[%s2380_s28 + $0x20] sm:$0xff]  ;;  %v2414_v20 = vld [vmem:[%s2380_s28 + $0x28] sm:$0xff] }
  0x4d   : > { %v1505_v10 = vadd.f32 %v996_v6, %v995_v5  ;;  %v998_v13 = vmul.f32 %v2404_v12, %v233_v11  ;;  %v999_v17 = vmul.f32 %v2409_v16, %v234_v15  ;;  %v1000_v21 = vmul.f32 %v2414_v20, %v235_v19  ;;  %v236_v23 = vld [vmem:[%s2374_s26 + $0x30] sm:$0xff]  ;;  %v237_v27 = vld [vmem:[%s2374_s26 + $0x38] sm:$0xff]  ;;  %v238_v31 = vld [vmem:[%s2374_s26 + $0x40] sm:$0xff] }
  0x4e   : > { %v2419_v24 = vld [vmem:[%s2380_s28 + $0x30] sm:$0xff]  ;;  %v2424_v28 = vld [vmem:[%s2380_s28 + $0x38] sm:$0xff]  ;;  %v2429_v32 = vld [vmem:[%s2380_s28 + $0x40] sm:$0xff] }
  0x4f   : > { %v1506_v14 = vadd.f32 %v1505_v10, %v997_v9  ;;  %v1001_v25 = vmul.f32 %v2419_v24, %v236_v23  ;;  %v1002_v29 = vmul.f32 %v2424_v28, %v237_v27  ;;  %v1003_v33 = vmul.f32 %v2429_v32, %v238_v31  ;;  %v239_v35 = vld [vmem:[%s2374_s26 + $0x48] sm:$0xff]  ;;  %v240_v39 = vld [vmem:[%s2374_s26 + $0x50] sm:$0xff]  ;;  %v241_v43 = vld [vmem:[%s2374_s26 + $0x58] sm:$0xff] }
  0x50   : > { %v2434_v36 = vld [vmem:[%s2380_s28 + $0x48] sm:$0xff]  ;;  %v2439_v40 = vld [vmem:[%s2380_s28 + $0x50] sm:$0xff]  ;;  %v2444_v44 = vld [vmem:[%s2380_s28 + $0x58] sm:$0xff] }
  0x51   : > { %v1507_v18 = vadd.f32 %v1506_v14, %v998_v13  ;;  %v1004_v37 = vmul.f32 %v2434_v36, %v239_v35  ;;  %v1005_v41 = vmul.f32 %v2439_v40, %v240_v39  ;;  %v1006_v45 = vmul.f32 %v2444_v44, %v241_v43  ;;  %v242_v47 = vld [vmem:[%s2374_s26 + $0x60] sm:$0xff]  ;;  %v243_v51 = vld [vmem:[%s2374_s26 + $0x68] sm:$0xff]  ;;  %v244_v55 = vld [vmem:[%s2374_s26 + $0x70] sm:$0xff] }
  0x52   : > { %v2449_v48 = vld [vmem:[%s2380_s28 + $0x60] sm:$0xff]  ;;  %v2454_v52 = vld [vmem:[%s2380_s28 + $0x68] sm:$0xff]  ;;  %v2459_v56 = vld [vmem:[%s2380_s28 + $0x70] sm:$0xff] }
  0x53   : > { %v1508_v22 = vadd.f32 %v1507_v18, %v999_v17  ;;  %v1007_v49 = vmul.f32 %v2449_v48, %v242_v47  ;;  %v1008_v53 = vmul.f32 %v2454_v52, %v243_v51  ;;  %v1009_v57 = vmul.f32 %v2459_v56, %v244_v55  ;;  %v245_v59 = vld [vmem:[%s2374_s26 + $0x78] sm:$0xff]  ;;  %v246_v63 = vld [vmem:[%s2374_s26 + $0x80] sm:$0xff]  ;;  %v247_v5 = vld [vmem:[%s2374_s26 + $0x88] sm:$0xff] }
  0x54   : > { %v2464_v60 = vld [vmem:[%s2380_s28 + $0x78] sm:$0xff]  ;;  %v2469_v0 = vld [vmem:[%s2380_s28 + $0x80] sm:$0xff]  ;;  %v2474_v6 = vld [vmem:[%s2380_s28 + $0x88] sm:$0xff] }
  0x55   : > { %v1509_v26 = vadd.f32 %v1508_v22, %v1000_v21  ;;  %v1010_v61 = vmul.f32 %v2464_v60, %v245_v59  ;;  %v1011_v1 = vmul.f32 %v2469_v0, %v246_v63  ;;  %v1012_v7 = vmul.f32 %v2474_v6, %v247_v5  ;;  %v248_v10 = vld [vmem:[%s2374_s26 + $0x90] sm:$0xff]  ;;  %v249_v15 = vld [vmem:[%s2374_s26 + $0x98] sm:$0xff]  ;;  %v250_v21 = vld [vmem:[%s2374_s26 + $0xa0] sm:$0xff] }
  0x56   : > { %v2479_v11 = vld [vmem:[%s2380_s28 + $0x90] sm:$0xff]  ;;  %v2484_v17 = vld [vmem:[%s2380_s28 + $0x98] sm:$0xff]  ;;  %v2489_v22 = vld [vmem:[%s2380_s28 + $0xa0] sm:$0xff] }
  0x57   : > { %v1510_v30 = vadd.f32 %v1509_v26, %v1001_v25  ;;  %v1013_v13 = vmul.f32 %v2479_v11, %v248_v10  ;;  %v1014_v18 = vmul.f32 %v2484_v17, %v249_v15  ;;  %v251_v23 = vld [vmem:[%s2374_s26 + $0xa8] sm:$0xff]  ;;  %v1015_v25 = vmul.f32 %v2489_v22, %v250_v21  ;;  %v485_v27 = vld [vmem:[%s2374_s26 + $0x7f8] sm:$0xff]  ;;  %v252_v31 = vld [vmem:[%s2374_s26 + $0xb0] sm:$0xff] }
  0x58   : > { %v2509_v43 = vld [vmem:[%s2380_s28 + $0xb8] sm:$0xff]  ;;  %v2530_v63 = vld [vmem:[%s2380_s28 + $0xd0] sm:$0xff]  ;;  %v2544_v21 = vld [vmem:[%s2380_s28 + $0xe0] sm:$0xff] }
  0x59   : > { %v1511_v34 = vadd.f32 %v1510_v30, %v1002_v29  ;;  %v486_v29 = vld [vmem:[%s2374_s26 + $0x800] sm:$0xff]  ;;  %v2496_v30 = vld [vmem:[%s2380_s28 + $0xa8] sm:$0xff] }
  0x5a   : > { %v1016_v35 = vmul.f32 %v2496_v30, %v251_v23  ;;  %v254_v47 = vld [vmem:[%s2374_s26 + $0xc0] sm:$0xff] }
  0x5b   : > { %v1512_v38 = vadd.f32 %v1511_v34, %v1003_v33  ;;  %v487_v33 = vld [vmem:[%s2374_s26 + $0x808] sm:$0xff]  ;;  %v2501_v34 = vld [vmem:[%s2380_s28 + $0xb0] sm:$0xff]  ;;  %v490_v55 = vld [vmem:[%s2374_s26 + $0x820] sm:$0xff] }
  0x5c   : > { %v2537_v10 = vld [vmem:[%s2380_s28 + $0xd8] sm:$0xff] }
  0x5d   : > { %v1513_v42 = vadd.f32 %v1512_v38, %v1004_v37  ;;  %v1250_v37 = vmul.f32 %v2390_v3, %v485_v27  ;;  %v1251_v38 = vmul.f32 %v2393_v4, %v486_v29  ;;  %v259_v29 = vld [vmem:[%s2374_s26 + $0xe8] sm:$0xff] }
  0x5f   : > { %v1514_v46 = vadd.f32 %v1513_v42, %v1005_v41  ;;  %v253_v41 = vld [vmem:[%s2374_s26 + $0xb8] sm:$0xff]  ;;  %v488_v42 = vld [vmem:[%s2374_s26 + $0x810] sm:$0xff] }
  0x60   : > { %v1018_v3 = vmul.f32 %v2509_v43, %v253_v41  ;;  %v1253_v4 = vmul.f32 %v2404_v12, %v488_v42  ;;  %v491_v12 = vld [vmem:[%s2374_s26 + $0x828] sm:$0xff]  ;;  %v2558_v41 = vld [vmem:[%s2380_s28 + $0xf0] sm:$0xff] }
  0x61   : > { %v1515_v50 = vadd.f32 %v1514_v46, %v1006_v45  ;;  %v1017_v45 = vmul.f32 %v2501_v34, %v252_v31  ;;  %v1252_v46 = vmul.f32 %v2399_v8, %v487_v33  ;;  %v2551_v31 = vld [vmem:[%s2380_s28 + $0xe8] sm:$0xff] }
  0x62   : > { %v1024_v42 = vmul.f32 %v2551_v31, %v259_v29 }
  0x63   : > { %v1516_v54 = vadd.f32 %v1515_v50, %v1007_v49  ;;  %v489_v49 = vld [vmem:[%s2374_s26 + $0x818] sm:$0xff]  ;;  %v2516_v50 = vld [vmem:[%s2380_s28 + $0xc0] sm:$0xff] }
  0x64   : > { %v1019_v8 = vmul.f32 %v2516_v50, %v254_v47 }
  0x65   : > { %v1517_v58 = vadd.f32 %v1516_v54, %v1008_v53  ;;  %v1759_v53 = vadd.f32 %v1251_v38, %v1250_v37  ;;  %v255_v54 = vld [vmem:[%s2374_s26 + $0xc8] sm:$0xff] }
  0x67   : > { %v1518_v62 = vadd.f32 %v1517_v58, %v1009_v57  ;;  %v2523_v57 = vld [vmem:[%s2380_s28 + $0xc8] sm:$0xff]  ;;  %v1254_v58 = vmul.f32 %v2409_v16, %v489_v49  ;;  %v261_v49 = vld [vmem:[%s2374_s26 + $0xf8] sm:$0xff] }
  0x68   : > { %v492_v16 = vld [vmem:[%s2374_s26 + $0x830] sm:$0xff] }
  0x69   : > { %v1519_v2 = vadd.f32 %v1518_v62, %v1010_v61  ;;  %v1760_v61 = vadd.f32 %v1759_v53, %v1252_v46  ;;  %v256_v62 = vld [vmem:[%s2374_s26 + $0xd0] sm:$0xff] }
  0x6b   : > { %v1520_v9 = vadd.f32 %v1519_v2, %v1011_v1  ;;  %v1020_v1 = vmul.f32 %v2523_v57, %v255_v54  ;;  %v1255_v2 = vmul.f32 %v2414_v20, %v490_v55  ;;  %v493_v20 = vld [vmem:[%s2374_s26 + $0x838] sm:$0xff]  ;;  %v262_v55 = vld [vmem:[%s2374_s26 + $0x100] sm:$0xff] }
  0x6d   : > { %v1521_v14 = vadd.f32 %v1520_v9, %v1012_v7  ;;  %v1761_v7 = vadd.f32 %v1760_v61, %v1253_v4  ;;  %v257_v9 = vld [vmem:[%s2374_s26 + $0xd8] sm:$0xff] }
  0x6e   : > { %v1022_v23 = vmul.f32 %v2537_v10, %v257_v9 }
  0x6f   : > { %v1522_v19 = vadd.f32 %v1521_v14, %v1013_v13  ;;  %v1021_v13 = vmul.f32 %v2530_v63, %v256_v62  ;;  %v1256_v14 = vmul.f32 %v2419_v24, %v491_v12  ;;  %v494_v24 = vld [vmem:[%s2374_s26 + $0x840] sm:$0xff]  ;;  %v263_v12 = vld [vmem:[%s2374_s26 + $0x108] sm:$0xff] }
  0x71   : > { %v1523_v26 = vadd.f32 %v1522_v19, %v1014_v18  ;;  %v1762_v18 = vadd.f32 %v1761_v7, %v1254_v58  ;;  %v258_v19 = vld [vmem:[%s2374_s26 + $0xe0] sm:$0xff] }
  0x72   : > { %v1023_v33 = vmul.f32 %v2544_v21, %v258_v19 }
  0x73   : > { %v1524_v39 = vadd.f32 %v1523_v26, %v1015_v25  ;;  %v1257_v25 = vmul.f32 %v2424_v28, %v492_v16  ;;  %v1763_v27 = vadd.f32 %v1762_v18, %v1255_v2  ;;  %v495_v28 = vld [vmem:[%s2374_s26 + $0x848] sm:$0xff]  ;;  %v264_v16 = vld [vmem:[%s2374_s26 + $0x110] sm:$0xff] }
  0x75   : > { %v1525_v51 = vadd.f32 %v1524_v39, %v1016_v35  ;;  %v1258_v35 = vmul.f32 %v2429_v32, %v493_v20  ;;  %v1764_v38 = vadd.f32 %v1763_v27, %v1256_v14  ;;  %v260_v39 = vld [vmem:[%s2374_s26 + $0xf0] sm:$0xff]  ;;  %v265_v20 = vld [vmem:[%s2374_s26 + $0x118] sm:$0xff] }
  0x76   : > { %v496_v32 = vld [vmem:[%s2374_s26 + $0x850] sm:$0xff]  ;;  %v1025_v4 = vmul.f32 %v2558_v41, %v260_v39 }
  0x77   : > { %v1526_v59 = vadd.f32 %v1525_v51, %v1017_v45  ;;  %v1259_v45 = vmul.f32 %v2434_v36, %v494_v24  ;;  %v1765_v47 = vadd.f32 %v1764_v38, %v1257_v25  ;;  %v1260_v51 = vmul.f32 %v2439_v40, %v495_v28  ;;  %v497_v36 = vld [vmem:[%s2374_s26 + $0x858] sm:$0xff]  ;;  %v498_v40 = vld [vmem:[%s2374_s26 + $0x860] sm:$0xff]  ;;  %v267_v28 = vld [vmem:[%s2374_s26 + $0x128] sm:$0xff] }
  0x78   : > { %v266_v24 = vld [vmem:[%s2374_s26 + $0x120] sm:$0xff] }
  0x79   : > { %v1527_v5 = vadd.f32 %v1526_v59, %v1018_v3  ;;  %v2565_v3 = vld [vmem:[%s2380_s28 + $0xf8] sm:$0xff]  ;;  %v1766_v54 = vadd.f32 %v1765_v47, %v1258_v35  ;;  %v1261_v59 = vmul.f32 %v2444_v44, %v496_v32  ;;  %v499_v44 = vld [vmem:[%s2374_s26 + $0x868] sm:$0xff]  ;;  %v268_v32 = vld [vmem:[%s2374_s26 + $0x130] sm:$0xff] }
  0x7a   : > { %v1026_v58 = vmul.f32 %v2565_v3, %v261_v49 }
  0x7b   : > { %v1528_v15 = vadd.f32 %v1527_v5, %v1019_v8  ;;  %v2572_v8 = vld [vmem:[%s2380_s28 + $0x100] sm:$0xff]  ;;  %v1767_v62 = vadd.f32 %v1766_v54, %v1259_v45  ;;  %v1262_v5 = vmul.f32 %v2449_v48, %v497_v36  ;;  %v500_v48 = vld [vmem:[%s2374_s26 + $0x870] sm:$0xff]  ;;  %v269_v36 = vld [vmem:[%s2374_s26 + $0x138] sm:$0xff] }
  0x7c   : > { %v1027_v2 = vmul.f32 %v2572_v8, %v262_v55 }
  0x7d   : > { %v1529_v26 = vadd.f32 %v1528_v15, %v1020_v1  ;;  %v2579_v1 = vld [vmem:[%s2380_s28 + $0x108] sm:$0xff]  ;;  %v1768_v9 = vadd.f32 %v1767_v62, %v1260_v51  ;;  %v1263_v15 = vmul.f32 %v2454_v52, %v498_v40  ;;  %v501_v52 = vld [vmem:[%s2374_s26 + $0x878] sm:$0xff]  ;;  %v270_v40 = vld [vmem:[%s2374_s26 + $0x140] sm:$0xff] }
  0x7e   : > { %v1028_v14 = vmul.f32 %v2579_v1, %v263_v12 }
  0x7f   : > { %v1530_v37 = vadd.f32 %v1529_v26, %v1021_v13  ;;  %v2586_v13 = vld [vmem:[%s2380_s28 + $0x110] sm:$0xff]  ;;  %v1769_v19 = vadd.f32 %v1768_v9, %v1261_v59  ;;  %v1264_v26 = vmul.f32 %v2459_v56, %v499_v44  ;;  %v502_v56 = vld [vmem:[%s2374_s26 + $0x880] sm:$0xff]  ;;  %v271_v44 = vld [vmem:[%s2374_s26 + $0x148] sm:$0xff] }
  0x80   : > { %v1029_v25 = vmul.f32 %v2586_v13, %v264_v16 }
  0x81   : > { %v1531_v46 = vadd.f32 %v1530_v37, %v1022_v23  ;;  %v2593_v23 = vld [vmem:[%s2380_s28 + $0x118] sm:$0xff]  ;;  %v1770_v29 = vadd.f32 %v1769_v19, %v1262_v5  ;;  %v1265_v37 = vmul.f32 %v2464_v60, %v500_v48  ;;  %v503_v60 = vld [vmem:[%s2374_s26 + $0x888] sm:$0xff]  ;;  %v272_v48 = vld [vmem:[%s2374_s26 + $0x150] sm:$0xff] }
  0x82   : > { %v1030_v35 = vmul.f32 %v2593_v23, %v265_v20 }
  0x83   : > { %v1532_v53 = vadd.f32 %v1531_v46, %v1023_v33  ;;  %v2600_v33 = vld [vmem:[%s2380_s28 + $0x120] sm:$0xff]  ;;  %v1771_v39 = vadd.f32 %v1770_v29, %v1263_v15  ;;  %v1266_v46 = vmul.f32 %v2469_v0, %v501_v52  ;;  %v504_v0 = vld [vmem:[%s2374_s26 + $0x890] sm:$0xff]  ;;  %v273_v52 = vld [vmem:[%s2374_s26 + $0x158] sm:$0xff] }
  0x84   : > { %v1031_v45 = vmul.f32 %v2600_v33, %v266_v24 }
  0x85   : > { %v1533_v61 = vadd.f32 %v1532_v53, %v1024_v42  ;;  %v2607_v42 = vld [vmem:[%s2380_s28 + $0x128] sm:$0xff]  ;;  %v1772_v49 = vadd.f32 %v1771_v39, %v1264_v26  ;;  %v1267_v53 = vmul.f32 %v2474_v6, %v502_v56  ;;  %v505_v6 = vld [vmem:[%s2374_s26 + $0x898] sm:$0xff]  ;;  %v274_v56 = vld [vmem:[%s2374_s26 + $0x160] sm:$0xff] }
  0x86   : > { %v1032_v51 = vmul.f32 %v2607_v42, %v267_v28 }
  0x87   : > { %v1534_v7 = vadd.f32 %v1533_v61, %v1025_v4  ;;  %v2614_v4 = vld [vmem:[%s2380_s28 + $0x130] sm:$0xff]  ;;  %v1773_v55 = vadd.f32 %v1772_v49, %v1265_v37  ;;  %v1268_v61 = vmul.f32 %v2479_v11, %v503_v60  ;;  %v506_v11 = vld [vmem:[%s2374_s26 + $0x8a0] sm:$0xff]  ;;  %v275_v60 = vld [vmem:[%s2374_s26 + $0x168] sm:$0xff] }
  0x88   : > { %v1033_v59 = vmul.f32 %v2614_v4, %v268_v32 }
  0x89   : > { %v1535_v18 = vadd.f32 %v1534_v7, %v1026_v58  ;;  %v2621_v58 = vld [vmem:[%s2380_s28 + $0x138] sm:$0xff]  ;;  %v1774_v12 = vadd.f32 %v1773_v55, %v1266_v46  ;;  %v1269_v7 = vmul.f32 %v2484_v17, %v504_v0  ;;  %v507_v17 = vld [vmem:[%s2374_s26 + $0x8a8] sm:$0xff]  ;;  %v276_v0 = vld [vmem:[%s2374_s26 + $0x170] sm:$0xff] }
  0x8a   : > { %v1034_v5 = vmul.f32 %v2621_v58, %v269_v36 }
  0x8b   : > { %v1536_v27 = vadd.f32 %v1535_v18, %v1027_v2  ;;  %v2628_v2 = vld [vmem:[%s2380_s28 + $0x140] sm:$0xff]  ;;  %v1775_v16 = vadd.f32 %v1774_v12, %v1267_v53  ;;  %v1270_v18 = vmul.f32 %v2489_v22, %v505_v6  ;;  %v508_v22 = vld [vmem:[%s2374_s26 + $0x8b0] sm:$0xff]  ;;  %v277_v6 = vld [vmem:[%s2374_s26 + $0x178] sm:$0xff] }
  0x8c   : > { %v1035_v15 = vmul.f32 %v2628_v2, %v270_v40 }
  0x8d   : > { %v1537_v38 = vadd.f32 %v1536_v27, %v1028_v14  ;;  %v2635_v14 = vld [vmem:[%s2380_s28 + $0x148] sm:$0xff]  ;;  %v1776_v20 = vadd.f32 %v1775_v16, %v1268_v61  ;;  %v1271_v27 = vmul.f32 %v2496_v30, %v506_v11  ;;  %v509_v30 = vld [vmem:[%s2374_s26 + $0x8b8] sm:$0xff]  ;;  %v278_v11 = vld [vmem:[%s2374_s26 + $0x180] sm:$0xff] }
  0x8e   : > { %v1036_v26 = vmul.f32 %v2635_v14, %v271_v44 }
  0x8f   : > { %v1538_v47 = vadd.f32 %v1537_v38, %v1029_v25  ;;  %v2642_v25 = vld [vmem:[%s2380_s28 + $0x150] sm:$0xff]  ;;  %v1777_v24 = vadd.f32 %v1776_v20, %v1269_v7  ;;  %v1272_v38 = vmul.f32 %v2501_v34, %v507_v17  ;;  %v510_v34 = vld [vmem:[%s2374_s26 + $0x8c0] sm:$0xff]  ;;  %v279_v17 = vld [vmem:[%s2374_s26 + $0x188] sm:$0xff] }
  0x90   : > { %v1037_v37 = vmul.f32 %v2642_v25, %v272_v48 }
  0x91   : > { %v1539_v54 = vadd.f32 %v1538_v47, %v1030_v35  ;;  %v2649_v35 = vld [vmem:[%s2380_s28 + $0x158] sm:$0xff]  ;;  %v1778_v28 = vadd.f32 %v1777_v24, %v1270_v18  ;;  %v1273_v47 = vmul.f32 %v2509_v43, %v508_v22  ;;  %v511_v43 = vld [vmem:[%s2374_s26 + $0x8c8] sm:$0xff]  ;;  %v280_v22 = vld [vmem:[%s2374_s26 + $0x190] sm:$0xff] }
  0x92   : > { %v1038_v46 = vmul.f32 %v2649_v35, %v273_v52 }
  0x93   : > { %v1540_v62 = vadd.f32 %v1539_v54, %v1031_v45  ;;  %v2656_v45 = vld [vmem:[%s2380_s28 + $0x160] sm:$0xff]  ;;  %v1779_v32 = vadd.f32 %v1778_v28, %v1271_v27  ;;  %v1274_v54 = vmul.f32 %v2516_v50, %v509_v30  ;;  %v512_v50 = vld [vmem:[%s2374_s26 + $0x8d0] sm:$0xff]  ;;  %v281_v30 = vld [vmem:[%s2374_s26 + $0x198] sm:$0xff] }
  0x94   : > { %v1039_v53 = vmul.f32 %v2656_v45, %v274_v56 }
  0x95   : > { %v1541_v9 = vadd.f32 %v1540_v62, %v1032_v51  ;;  %v2663_v51 = vld [vmem:[%s2380_s28 + $0x168] sm:$0xff]  ;;  %v1780_v36 = vadd.f32 %v1779_v32, %v1272_v38  ;;  %v1275_v62 = vmul.f32 %v2523_v57, %v510_v34  ;;  %v513_v57 = vld [vmem:[%s2374_s26 + $0x8d8] sm:$0xff]  ;;  %v282_v34 = vld [vmem:[%s2374_s26 + $0x1a0] sm:$0xff] }
  0x96   : > { %v1040_v61 = vmul.f32 %v2663_v51, %v275_v60 }
  0x97   : > { %v1542_v19 = vadd.f32 %v1541_v9, %v1033_v59  ;;  %v2670_v59 = vld [vmem:[%s2380_s28 + $0x170] sm:$0xff]  ;;  %v1781_v40 = vadd.f32 %v1780_v36, %v1273_v47  ;;  %v1276_v9 = vmul.f32 %v2530_v63, %v511_v43  ;;  %v514_v63 = vld [vmem:[%s2374_s26 + $0x8e0] sm:$0xff]  ;;  %v283_v43 = vld [vmem:[%s2374_s26 + $0x1a8] sm:$0xff] }
  0x98   : > { %v1041_v7 = vmul.f32 %v2670_v59, %v276_v0 }
  0x99   : > { %v1543_v29 = vadd.f32 %v1542_v19, %v1034_v5  ;;  %v2677_v5 = vld [vmem:[%s2380_s28 + $0x178] sm:$0xff]  ;;  %v1782_v44 = vadd.f32 %v1781_v40, %v1274_v54  ;;  %v1277_v19 = vmul.f32 %v2537_v10, %v512_v50  ;;  %v515_v10 = vld [vmem:[%s2374_s26 + $0x8e8] sm:$0xff]  ;;  %v284_v50 = vld [vmem:[%s2374_s26 + $0x1b0] sm:$0xff] }
  0x9a   : > { %v1042_v18 = vmul.f32 %v2677_v5, %v277_v6 }
  0x9b   : > { %v1544_v39 = vadd.f32 %v1543_v29, %v1035_v15  ;;  %v2684_v15 = vld [vmem:[%s2380_s28 + $0x180] sm:$0xff]  ;;  %v1783_v48 = vadd.f32 %v1782_v44, %v1275_v62  ;;  %v1278_v29 = vmul.f32 %v2544_v21, %v513_v57  ;;  %v516_v21 = vld [vmem:[%s2374_s26 + $0x8f0] sm:$0xff]  ;;  %v285_v57 = vld [vmem:[%s2374_s26 + $0x1b8] sm:$0xff] }
  0x9c   : > { %v1043_v27 = vmul.f32 %v2684_v15, %v278_v11 }
  0x9d   : > { %v1545_v49 = vadd.f32 %v1544_v39, %v1036_v26  ;;  %v2691_v26 = vld [vmem:[%s2380_s28 + $0x188] sm:$0xff]  ;;  %v1784_v52 = vadd.f32 %v1783_v48, %v1276_v9  ;;  %v1279_v39 = vmul.f32 %v2551_v31, %v514_v63  ;;  %v517_v31 = vld [vmem:[%s2374_s26 + $0x8f8] sm:$0xff]  ;;  %v286_v63 = vld [vmem:[%s2374_s26 + $0x1c0] sm:$0xff] }
  0x9e   : > { %v1044_v38 = vmul.f32 %v2691_v26, %v279_v17 }
  0x9f   : > { %v1546_v55 = vadd.f32 %v1545_v49, %v1037_v37  ;;  %v2698_v37 = vld [vmem:[%s2380_s28 + $0x190] sm:$0xff]  ;;  %v1785_v56 = vadd.f32 %v1784_v52, %v1277_v19  ;;  %v1280_v49 = vmul.f32 %v2558_v41, %v515_v10  ;;  %v518_v41 = vld [vmem:[%s2374_s26 + $0x900] sm:$0xff]  ;;  %v287_v10 = vld [vmem:[%s2374_s26 + $0x1c8] sm:$0xff] }
  0xa0   : > { %v1045_v47 = vmul.f32 %v2698_v37, %v280_v22 }
  0xa1   : > { %v1547_v12 = vadd.f32 %v1546_v55, %v1038_v46  ;;  %v2705_v46 = vld [vmem:[%s2380_s28 + $0x198] sm:$0xff]  ;;  %v1786_v60 = vadd.f32 %v1785_v56, %v1278_v29  ;;  %v1281_v55 = vmul.f32 %v2565_v3, %v516_v21  ;;  %v519_v3 = vld [vmem:[%s2374_s26 + $0x908] sm:$0xff]  ;;  %v288_v21 = vld [vmem:[%s2374_s26 + $0x1d0] sm:$0xff] }
  0xa2   : > { %v1046_v54 = vmul.f32 %v2705_v46, %v281_v30 }
  0xa3   : > { %v1548_v16 = vadd.f32 %v1547_v12, %v1039_v53  ;;  %v2712_v53 = vld [vmem:[%s2380_s28 + $0x1a0] sm:$0xff]  ;;  %v1787_v0 = vadd.f32 %v1786_v60, %v1279_v39  ;;  %v1282_v12 = vmul.f32 %v2572_v8, %v517_v31  ;;  %v520_v8 = vld [vmem:[%s2374_s26 + $0x910] sm:$0xff]  ;;  %v289_v31 = vld [vmem:[%s2374_s26 + $0x1d8] sm:$0xff] }
  0xa4   : > { %v1047_v62 = vmul.f32 %v2712_v53, %v282_v34 }
  0xa5   : > { %v1549_v20 = vadd.f32 %v1548_v16, %v1040_v61  ;;  %v2719_v61 = vld [vmem:[%s2380_s28 + $0x1a8] sm:$0xff]  ;;  %v1788_v6 = vadd.f32 %v1787_v0, %v1280_v49  ;;  %v1283_v16 = vmul.f32 %v2579_v1, %v518_v41  ;;  %v521_v1 = vld [vmem:[%s2374_s26 + $0x918] sm:$0xff]  ;;  %v290_v41 = vld [vmem:[%s2374_s26 + $0x1e0] sm:$0xff] }
  0xa6   : > { %v1048_v9 = vmul.f32 %v2719_v61, %v283_v43 }
  0xa7   : > { %v1550_v24 = vadd.f32 %v1549_v20, %v1041_v7  ;;  %v2726_v7 = vld [vmem:[%s2380_s28 + $0x1b0] sm:$0xff]  ;;  %v1789_v11 = vadd.f32 %v1788_v6, %v1281_v55  ;;  %v1284_v20 = vmul.f32 %v2586_v13, %v519_v3  ;;  %v522_v13 = vld [vmem:[%s2374_s26 + $0x920] sm:$0xff]  ;;  %v291_v3 = vld [vmem:[%s2374_s26 + $0x1e8] sm:$0xff] }
  0xa8   : > { %v1049_v19 = vmul.f32 %v2726_v7, %v284_v50 }
  0xa9   : > { %v1551_v28 = vadd.f32 %v1550_v24, %v1042_v18  ;;  %v2733_v18 = vld [vmem:[%s2380_s28 + $0x1b8] sm:$0xff]  ;;  %v1790_v17 = vadd.f32 %v1789_v11, %v1282_v12  ;;  %v1285_v24 = vmul.f32 %v2593_v23, %v520_v8  ;;  %v523_v23 = vld [vmem:[%s2374_s26 + $0x928] sm:$0xff]  ;;  %v292_v8 = vld [vmem:[%s2374_s26 + $0x1f0] sm:$0xff] }
  0xaa   : > { %v1050_v29 = vmul.f32 %v2733_v18, %v285_v57 }
  0xab   : > { %v1552_v32 = vadd.f32 %v1551_v28, %v1043_v27  ;;  %v2740_v27 = vld [vmem:[%s2380_s28 + $0x1c0] sm:$0xff]  ;;  %v1791_v22 = vadd.f32 %v1790_v17, %v1283_v16  ;;  %v1286_v28 = vmul.f32 %v2600_v33, %v521_v1  ;;  %v524_v33 = vld [vmem:[%s2374_s26 + $0x930] sm:$0xff]  ;;  %v293_v1 = vld [vmem:[%s2374_s26 + $0x1f8] sm:$0xff] }
  0xac   : > { %v1051_v39 = vmul.f32 %v2740_v27, %v286_v63 }
  0xad   : > { %v1553_v36 = vadd.f32 %v1552_v32, %v1044_v38  ;;  %v2747_v38 = vld [vmem:[%s2380_s28 + $0x1c8] sm:$0xff]  ;;  %v1792_v30 = vadd.f32 %v1791_v22, %v1284_v20  ;;  %v1287_v32 = vmul.f32 %v2607_v42, %v522_v13  ;;  %v525_v42 = vld [vmem:[%s2374_s26 + $0x938] sm:$0xff]  ;;  %v294_v13 = vld [vmem:[%s2374_s26 + $0x200] sm:$0xff] }
  0xae   : > { %v1052_v49 = vmul.f32 %v2747_v38, %v287_v10 }
  0xaf   : > { %v1554_v40 = vadd.f32 %v1553_v36, %v1045_v47  ;;  %v2754_v47 = vld [vmem:[%s2380_s28 + $0x1d0] sm:$0xff]  ;;  %v1793_v34 = vadd.f32 %v1792_v30, %v1285_v24  ;;  %v1288_v36 = vmul.f32 %v2614_v4, %v523_v23  ;;  %v526_v4 = vld [vmem:[%s2374_s26 + $0x940] sm:$0xff]  ;;  %v295_v23 = vld [vmem:[%s2374_s26 + $0x208] sm:$0xff] }
  0xb0   : > { %v1053_v55 = vmul.f32 %v2754_v47, %v288_v21 }
  0xb1   : > { %v1555_v44 = vadd.f32 %v1554_v40, %v1046_v54  ;;  %v2761_v54 = vld [vmem:[%s2380_s28 + $0x1d8] sm:$0xff]  ;;  %v1794_v43 = vadd.f32 %v1793_v34, %v1286_v28  ;;  %v1289_v40 = vmul.f32 %v2621_v58, %v524_v33  ;;  %v527_v58 = vld [vmem:[%s2374_s26 + $0x948] sm:$0xff]  ;;  %v296_v33 = vld [vmem:[%s2374_s26 + $0x210] sm:$0xff] }
  0xb2   : > { %v1054_v12 = vmul.f32 %v2761_v54, %v289_v31 }
  0xb3   : > { %v1556_v48 = vadd.f32 %v1555_v44, %v1047_v62  ;;  %v2768_v62 = vld [vmem:[%s2380_s28 + $0x1e0] sm:$0xff]  ;;  %v1795_v50 = vadd.f32 %v1794_v43, %v1287_v32  ;;  %v1290_v44 = vmul.f32 %v2628_v2, %v525_v42  ;;  %v528_v2 = vld [vmem:[%s2374_s26 + $0x950] sm:$0xff]  ;;  %v297_v42 = vld [vmem:[%s2374_s26 + $0x218] sm:$0xff] }
  0xb4   : > { %v1055_v16 = vmul.f32 %v2768_v62, %v290_v41 }
  0xb5   : > { %v1557_v52 = vadd.f32 %v1556_v48, %v1048_v9  ;;  %v2775_v9 = vld [vmem:[%s2380_s28 + $0x1e8] sm:$0xff]  ;;  %v1796_v57 = vadd.f32 %v1795_v50, %v1288_v36  ;;  %v1291_v48 = vmul.f32 %v2635_v14, %v526_v4  ;;  %v529_v14 = vld [vmem:[%s2374_s26 + $0x958] sm:$0xff]  ;;  %v298_v4 = vld [vmem:[%s2374_s26 + $0x220] sm:$0xff] }
  0xb6   : > { %v1056_v20 = vmul.f32 %v2775_v9, %v291_v3 }
  0xb7   : > { %v1558_v56 = vadd.f32 %v1557_v52, %v1049_v19  ;;  %v2782_v19 = vld [vmem:[%s2380_s28 + $0x1f0] sm:$0xff]  ;;  %v1797_v63 = vadd.f32 %v1796_v57, %v1289_v40  ;;  %v1292_v52 = vmul.f32 %v2642_v25, %v527_v58  ;;  %v530_v25 = vld [vmem:[%s2374_s26 + $0x960] sm:$0xff]  ;;  %v299_v58 = vld [vmem:[%s2374_s26 + $0x228] sm:$0xff] }
  0xb8   : > { %v1057_v24 = vmul.f32 %v2782_v19, %v292_v8 }
  0xb9   : > { %v1559_v60 = vadd.f32 %v1558_v56, %v1050_v29  ;;  %v2789_v29 = vld [vmem:[%s2380_s28 + $0x1f8] sm:$0xff]  ;;  %v1798_v10 = vadd.f32 %v1797_v63, %v1290_v44  ;;  %v1293_v56 = vmul.f32 %v2649_v35, %v528_v2  ;;  %v531_v35 = vld [vmem:[%s2374_s26 + $0x968] sm:$0xff]  ;;  %v300_v2 = vld [vmem:[%s2374_s26 + $0x230] sm:$0xff] }
  0xba   : > { %v1058_v28 = vmul.f32 %v2789_v29, %v293_v1 }
  0xbb   : > { %v1560_v0 = vadd.f32 %v1559_v60, %v1051_v39  ;;  %v2796_v39 = vld [vmem:[%s2380_s28 + $0x200] sm:$0xff]  ;;  %v1799_v21 = vadd.f32 %v1798_v10, %v1291_v48  ;;  %v1294_v60 = vmul.f32 %v2656_v45, %v529_v14  ;;  %v532_v45 = vld [vmem:[%s2374_s26 + $0x970] sm:$0xff]  ;;  %v301_v14 = vld [vmem:[%s2374_s26 + $0x238] sm:$0xff] }
  0xbc   : > { %v1059_v32 = vmul.f32 %v2796_v39, %v294_v13 }
  0xbd   : > { %v1561_v6 = vadd.f32 %v1560_v0, %v1052_v49  ;;  %v2803_v49 = vld [vmem:[%s2380_s28 + $0x208] sm:$0xff]  ;;  %v1800_v31 = vadd.f32 %v1799_v21, %v1292_v52  ;;  %v1295_v0 = vmul.f32 %v2663_v51, %v530_v25  ;;  %v533_v51 = vld [vmem:[%s2374_s26 + $0x978] sm:$0xff]  ;;  %v302_v25 = vld [vmem:[%s2374_s26 + $0x240] sm:$0xff] }
  0xbe   : > { %v1060_v36 = vmul.f32 %v2803_v49, %v295_v23 }
  0xbf   : > { %v1562_v11 = vadd.f32 %v1561_v6, %v1053_v55  ;;  %v2810_v55 = vld [vmem:[%s2380_s28 + $0x210] sm:$0xff]  ;;  %v1801_v41 = vadd.f32 %v1800_v31, %v1293_v56  ;;  %v1296_v6 = vmul.f32 %v2670_v59, %v531_v35  ;;  %v534_v59 = vld [vmem:[%s2374_s26 + $0x980] sm:$0xff]  ;;  %v303_v35 = vld [vmem:[%s2374_s26 + $0x248] sm:$0xff] }
  0xc0   : > { %v1061_v40 = vmul.f32 %v2810_v55, %v296_v33 }
  0xc1   : > { %v1563_v17 = vadd.f32 %v1562_v11, %v1054_v12  ;;  %v2817_v12 = vld [vmem:[%s2380_s28 + $0x218] sm:$0xff]  ;;  %v1802_v3 = vadd.f32 %v1801_v41, %v1294_v60  ;;  %v1297_v11 = vmul.f32 %v2677_v5, %v532_v45  ;;  %v535_v5 = vld [vmem:[%s2374_s26 + $0x988] sm:$0xff]  ;;  %v304_v45 = vld [vmem:[%s2374_s26 + $0x250] sm:$0xff] }
  0xc2   : > { %v1062_v44 = vmul.f32 %v2817_v12, %v297_v42 }
  0xc3   : > { %v1564_v22 = vadd.f32 %v1563_v17, %v1055_v16  ;;  %v2824_v16 = vld [vmem:[%s2380_s28 + $0x220] sm:$0xff]  ;;  %v1803_v8 = vadd.f32 %v1802_v3, %v1295_v0  ;;  %v1298_v17 = vmul.f32 %v2684_v15, %v533_v51  ;;  %v536_v15 = vld [vmem:[%s2374_s26 + $0x990] sm:$0xff]  ;;  %v305_v51 = vld [vmem:[%s2374_s26 + $0x258] sm:$0xff] }
  0xc4   : > { %v1063_v48 = vmul.f32 %v2824_v16, %v298_v4 }
  0xc5   : > { %v1565_v30 = vadd.f32 %v1564_v22, %v1056_v20  ;;  %v2831_v20 = vld [vmem:[%s2380_s28 + $0x228] sm:$0xff]  ;;  %v1804_v1 = vadd.f32 %v1803_v8, %v1296_v6  ;;  %v1299_v22 = vmul.f32 %v2691_v26, %v534_v59  ;;  %v537_v26 = vld [vmem:[%s2374_s26 + $0x998] sm:$0xff]  ;;  %v306_v59 = vld [vmem:[%s2374_s26 + $0x260] sm:$0xff] }
  0xc6   : > { %v1064_v52 = vmul.f32 %v2831_v20, %v299_v58 }
  0xc7   : > { %v1566_v34 = vadd.f32 %v1565_v30, %v1057_v24  ;;  %v2838_v24 = vld [vmem:[%s2380_s28 + $0x230] sm:$0xff]  ;;  %v1805_v13 = vadd.f32 %v1804_v1, %v1297_v11  ;;  %v1300_v30 = vmul.f32 %v2698_v37, %v535_v5  ;;  %v538_v37 = vld [vmem:[%s2374_s26 + $0x9a0] sm:$0xff]  ;;  %v307_v5 = vld [vmem:[%s2374_s26 + $0x268] sm:$0xff] }
  0xc8   : > { %v1065_v56 = vmul.f32 %v2838_v24, %v300_v2 }
  0xc9   : > { %v1567_v43 = vadd.f32 %v1566_v34, %v1058_v28  ;;  %v2845_v28 = vld [vmem:[%s2380_s28 + $0x238] sm:$0xff]  ;;  %v1806_v23 = vadd.f32 %v1805_v13, %v1298_v17  ;;  %v1301_v34 = vmul.f32 %v2705_v46, %v536_v15  ;;  %v539_v46 = vld [vmem:[%s2374_s26 + $0x9a8] sm:$0xff]  ;;  %v308_v15 = vld [vmem:[%s2374_s26 + $0x270] sm:$0xff] }
  0xca   : > { %v1066_v60 = vmul.f32 %v2845_v28, %v301_v14 }
  0xcb   : > { %v1568_v50 = vadd.f32 %v1567_v43, %v1059_v32  ;;  %v2852_v32 = vld [vmem:[%s2380_s28 + $0x240] sm:$0xff]  ;;  %v1807_v33 = vadd.f32 %v1806_v23, %v1299_v22  ;;  %v1302_v43 = vmul.f32 %v2712_v53, %v537_v26  ;;  %v540_v53 = vld [vmem:[%s2374_s26 + $0x9b0] sm:$0xff]  ;;  %v309_v26 = vld [vmem:[%s2374_s26 + $0x278] sm:$0xff] }
  0xcc   : > { %v1067_v0 = vmul.f32 %v2852_v32, %v302_v25 }
  0xcd   : > { %v1569_v57 = vadd.f32 %v1568_v50, %v1060_v36  ;;  %v2859_v36 = vld [vmem:[%s2380_s28 + $0x248] sm:$0xff]  ;;  %v1808_v42 = vadd.f32 %v1807_v33, %v1300_v30  ;;  %v1303_v50 = vmul.f32 %v2719_v61, %v538_v37  ;;  %v541_v61 = vld [vmem:[%s2374_s26 + $0x9b8] sm:$0xff]  ;;  %v310_v37 = vld [vmem:[%s2374_s26 + $0x280] sm:$0xff] }
  0xce   : > { %v1068_v6 = vmul.f32 %v2859_v36, %v303_v35 }
  0xcf   : > { %v1570_v63 = vadd.f32 %v1569_v57, %v1061_v40  ;;  %v2866_v40 = vld [vmem:[%s2380_s28 + $0x250] sm:$0xff]  ;;  %v1809_v4 = vadd.f32 %v1808_v42, %v1301_v34  ;;  %v1304_v57 = vmul.f32 %v2726_v7, %v539_v46  ;;  %v542_v7 = vld [vmem:[%s2374_s26 + $0x9c0] sm:$0xff]  ;;  %v311_v46 = vld [vmem:[%s2374_s26 + $0x288] sm:$0xff] }
  0xd0   : > { %v1069_v11 = vmul.f32 %v2866_v40, %v304_v45 }
  0xd1   : > { %v1571_v10 = vadd.f32 %v1570_v63, %v1062_v44  ;;  %v2873_v44 = vld [vmem:[%s2380_s28 + $0x258] sm:$0xff]  ;;  %v1810_v58 = vadd.f32 %v1809_v4, %v1302_v43  ;;  %v1305_v63 = vmul.f32 %v2733_v18, %v540_v53  ;;  %v543_v18 = vld [vmem:[%s2374_s26 + $0x9c8] sm:$0xff]  ;;  %v312_v53 = vld [vmem:[%s2374_s26 + $0x290] sm:$0xff] }
  0xd2   : > { %v1070_v17 = vmul.f32 %v2873_v44, %v305_v51 }
  0xd3   : > { %v1572_v21 = vadd.f32 %v1571_v10, %v1063_v48  ;;  %v2880_v48 = vld [vmem:[%s2380_s28 + $0x260] sm:$0xff]  ;;  %v1811_v2 = vadd.f32 %v1810_v58, %v1303_v50  ;;  %v1306_v10 = vmul.f32 %v2740_v27, %v541_v61  ;;  %v544_v27 = vld [vmem:[%s2374_s26 + $0x9d0] sm:$0xff]  ;;  %v313_v61 = vld [vmem:[%s2374_s26 + $0x298] sm:$0xff] }
  0xd4   : > { %v1071_v22 = vmul.f32 %v2880_v48, %v306_v59 }
  0xd5   : > { %v1573_v31 = vadd.f32 %v1572_v21, %v1064_v52  ;;  %v2887_v52 = vld [vmem:[%s2380_s28 + $0x268] sm:$0xff]  ;;  %v1812_v14 = vadd.f32 %v1811_v2, %v1304_v57  ;;  %v1307_v21 = vmul.f32 %v2747_v38, %v542_v7  ;;  %v545_v38 = vld [vmem:[%s2374_s26 + $0x9d8] sm:$0xff]  ;;  %v314_v7 = vld [vmem:[%s2374_s26 + $0x2a0] sm:$0xff] }
  0xd6   : > { %v1072_v30 = vmul.f32 %v2887_v52, %v307_v5 }
  0xd7   : > { %v1574_v41 = vadd.f32 %v1573_v31, %v1065_v56  ;;  %v2894_v56 = vld [vmem:[%s2380_s28 + $0x270] sm:$0xff]  ;;  %v1813_v25 = vadd.f32 %v1812_v14, %v1305_v63  ;;  %v1308_v31 = vmul.f32 %v2754_v47, %v543_v18  ;;  %v546_v47 = vld [vmem:[%s2374_s26 + $0x9e0] sm:$0xff]  ;;  %v315_v18 = vld [vmem:[%s2374_s26 + $0x2a8] sm:$0xff] }
  0xd8   : > { %v1073_v34 = vmul.f32 %v2894_v56, %v308_v15 }
  0xd9   : > { %v1575_v3 = vadd.f32 %v1574_v41, %v1066_v60  ;;  %v2901_v60 = vld [vmem:[%s2380_s28 + $0x278] sm:$0xff]  ;;  %v1814_v35 = vadd.f32 %v1813_v25, %v1306_v10  ;;  %v1309_v41 = vmul.f32 %v2761_v54, %v544_v27  ;;  %v547_v54 = vld [vmem:[%s2374_s26 + $0x9e8] sm:$0xff]  ;;  %v316_v27 = vld [vmem:[%s2374_s26 + $0x2b0] sm:$0xff] }
  0xda   : > { %v1074_v43 = vmul.f32 %v2901_v60, %v309_v26 }
  0xdb   : > { %v1576_v8 = vadd.f32 %v1575_v3, %v1067_v0  ;;  %v2908_v0 = vld [vmem:[%s2380_s28 + $0x280] sm:$0xff]  ;;  %v1815_v45 = vadd.f32 %v1814_v35, %v1307_v21  ;;  %v1310_v3 = vmul.f32 %v2768_v62, %v545_v38  ;;  %v548_v62 = vld [vmem:[%s2374_s26 + $0x9f0] sm:$0xff]  ;;  %v317_v38 = vld [vmem:[%s2374_s26 + $0x2b8] sm:$0xff] }
  0xdc   : > { %v1075_v50 = vmul.f32 %v2908_v0, %v310_v37 }
  0xdd   : > { %v1577_v1 = vadd.f32 %v1576_v8, %v1068_v6  ;;  %v2915_v6 = vld [vmem:[%s2380_s28 + $0x288] sm:$0xff]  ;;  %v1816_v51 = vadd.f32 %v1815_v45, %v1308_v31  ;;  %v1311_v8 = vmul.f32 %v2775_v9, %v546_v47  ;;  %v549_v9 = vld [vmem:[%s2374_s26 + $0x9f8] sm:$0xff]  ;;  %v318_v47 = vld [vmem:[%s2374_s26 + $0x2c0] sm:$0xff] }
  0xde   : > { %v1076_v57 = vmul.f32 %v2915_v6, %v311_v46 }
  0xdf   : > { %v1578_v13 = vadd.f32 %v1577_v1, %v1069_v11  ;;  %v2922_v11 = vld [vmem:[%s2380_s28 + $0x290] sm:$0xff]  ;;  %v1817_v59 = vadd.f32 %v1816_v51, %v1309_v41  ;;  %v1312_v1 = vmul.f32 %v2782_v19, %v547_v54  ;;  %v550_v19 = vld [vmem:[%s2374_s26 + $0xa00] sm:$0xff]  ;;  %v319_v54 = vld [vmem:[%s2374_s26 + $0x2c8] sm:$0xff] }
  0xe0   : > { %v1077_v63 = vmul.f32 %v2922_v11, %v312_v53 }
  0xe1   : > { %v1579_v23 = vadd.f32 %v1578_v13, %v1070_v17  ;;  %v2929_v17 = vld [vmem:[%s2380_s28 + $0x298] sm:$0xff]  ;;  %v1818_v5 = vadd.f32 %v1817_v59, %v1310_v3  ;;  %v1313_v13 = vmul.f32 %v2789_v29, %v548_v62  ;;  %v551_v29 = vld [vmem:[%s2374_s26 + $0xa08] sm:$0xff]  ;;  %v320_v62 = vld [vmem:[%s2374_s26 + $0x2d0] sm:$0xff] }
  0xe2   : > { %v1078_v10 = vmul.f32 %v2929_v17, %v313_v61 }
  0xe3   : > { %v1580_v33 = vadd.f32 %v1579_v23, %v1071_v22  ;;  %v2936_v22 = vld [vmem:[%s2380_s28 + $0x2a0] sm:$0xff]  ;;  %v1819_v15 = vadd.f32 %v1818_v5, %v1311_v8  ;;  %v1314_v23 = vmul.f32 %v2796_v39, %v549_v9  ;;  %v552_v39 = vld [vmem:[%s2374_s26 + $0xa10] sm:$0xff]  ;;  %v321_v9 = vld [vmem:[%s2374_s26 + $0x2d8] sm:$0xff] }
  0xe4   : > { %v1079_v21 = vmul.f32 %v2936_v22, %v314_v7 }
  0xe5   : > { %v1581_v42 = vadd.f32 %v1580_v33, %v1072_v30  ;;  %v2943_v30 = vld [vmem:[%s2380_s28 + $0x2a8] sm:$0xff]  ;;  %v1820_v26 = vadd.f32 %v1819_v15, %v1312_v1  ;;  %v1315_v33 = vmul.f32 %v2803_v49, %v550_v19  ;;  %v553_v49 = vld [vmem:[%s2374_s26 + $0xa18] sm:$0xff]  ;;  %v322_v19 = vld [vmem:[%s2374_s26 + $0x2e0] sm:$0xff] }
  0xe6   : > { %v1080_v31 = vmul.f32 %v2943_v30, %v315_v18 }
  0xe7   : > { %v1582_v4 = vadd.f32 %v1581_v42, %v1073_v34  ;;  %v2950_v34 = vld [vmem:[%s2380_s28 + $0x2b0] sm:$0xff]  ;;  %v1821_v37 = vadd.f32 %v1820_v26, %v1313_v13  ;;  %v1316_v42 = vmul.f32 %v2810_v55, %v551_v29  ;;  %v554_v55 = vld [vmem:[%s2374_s26 + $0xa20] sm:$0xff]  ;;  %v323_v29 = vld [vmem:[%s2374_s26 + $0x2e8] sm:$0xff] }
  0xe8   : > { %v1081_v41 = vmul.f32 %v2950_v34, %v316_v27 }
  0xe9   : > { %v1583_v58 = vadd.f32 %v1582_v4, %v1074_v43  ;;  %v2957_v43 = vld [vmem:[%s2380_s28 + $0x2b8] sm:$0xff]  ;;  %v1822_v46 = vadd.f32 %v1821_v37, %v1314_v23  ;;  %v1317_v4 = vmul.f32 %v2817_v12, %v552_v39  ;;  %v555_v12 = vld [vmem:[%s2374_s26 + $0xa28] sm:$0xff]  ;;  %v324_v39 = vld [vmem:[%s2374_s26 + $0x2f0] sm:$0xff] }
  0xea   : > { %v1082_v3 = vmul.f32 %v2957_v43, %v317_v38 }
  0xeb   : > { %v1584_v2 = vadd.f32 %v1583_v58, %v1075_v50  ;;  %v2964_v50 = vld [vmem:[%s2380_s28 + $0x2c0] sm:$0xff]  ;;  %v1823_v53 = vadd.f32 %v1822_v46, %v1315_v33  ;;  %v1318_v58 = vmul.f32 %v2824_v16, %v553_v49  ;;  %v556_v16 = vld [vmem:[%s2374_s26 + $0xa30] sm:$0xff]  ;;  %v325_v49 = vld [vmem:[%s2374_s26 + $0x2f8] sm:$0xff] }
  0xec   : > { %v1083_v8 = vmul.f32 %v2964_v50, %v318_v47 }
  0xed   : > { %v1585_v14 = vadd.f32 %v1584_v2, %v1076_v57  ;;  %v2971_v57 = vld [vmem:[%s2380_s28 + $0x2c8] sm:$0xff]  ;;  %v1824_v61 = vadd.f32 %v1823_v53, %v1316_v42  ;;  %v1319_v2 = vmul.f32 %v2831_v20, %v554_v55  ;;  %v557_v20 = vld [vmem:[%s2374_s26 + $0xa38] sm:$0xff]  ;;  %v326_v55 = vld [vmem:[%s2374_s26 + $0x300] sm:$0xff] }
  0xee   : > { %v1084_v1 = vmul.f32 %v2971_v57, %v319_v54 }
  0xef   : > { %v1586_v25 = vadd.f32 %v1585_v14, %v1077_v63  ;;  %v2978_v63 = vld [vmem:[%s2380_s28 + $0x2d0] sm:$0xff]  ;;  %v1825_v7 = vadd.f32 %v1824_v61, %v1317_v4  ;;  %v1320_v14 = vmul.f32 %v2838_v24, %v555_v12  ;;  %v558_v24 = vld [vmem:[%s2374_s26 + $0xa40] sm:$0xff]  ;;  %v327_v12 = vld [vmem:[%s2374_s26 + $0x308] sm:$0xff] }
  0xf0   : > { %v1085_v13 = vmul.f32 %v2978_v63, %v320_v62 }
  0xf1   : > { %v1587_v35 = vadd.f32 %v1586_v25, %v1078_v10  ;;  %v2985_v10 = vld [vmem:[%s2380_s28 + $0x2d8] sm:$0xff]  ;;  %v1826_v18 = vadd.f32 %v1825_v7, %v1318_v58  ;;  %v1321_v25 = vmul.f32 %v2845_v28, %v556_v16  ;;  %v559_v28 = vld [vmem:[%s2374_s26 + $0xa48] sm:$0xff]  ;;  %v328_v16 = vld [vmem:[%s2374_s26 + $0x310] sm:$0xff] }
  0xf2   : > { %v1086_v23 = vmul.f32 %v2985_v10, %v321_v9 }
  0xf3   : > { %v1588_v45 = vadd.f32 %v1587_v35, %v1079_v21  ;;  %v2992_v21 = vld [vmem:[%s2380_s28 + $0x2e0] sm:$0xff]  ;;  %v1827_v27 = vadd.f32 %v1826_v18, %v1319_v2  ;;  %v1322_v35 = vmul.f32 %v2852_v32, %v557_v20  ;;  %v560_v32 = vld [vmem:[%s2374_s26 + $0xa50] sm:$0xff]  ;;  %v329_v20 = vld [vmem:[%s2374_s26 + $0x318] sm:$0xff] }
  0xf4   : > { %v1087_v33 = vmul.f32 %v2992_v21, %v322_v19 }
  0xf5   : > { %v1589_v51 = vadd.f32 %v1588_v45, %v1080_v31  ;;  %v2999_v31 = vld [vmem:[%s2380_s28 + $0x2e8] sm:$0xff]  ;;  %v1828_v38 = vadd.f32 %v1827_v27, %v1320_v14  ;;  %v1323_v45 = vmul.f32 %v2859_v36, %v558_v24  ;;  %v561_v36 = vld [vmem:[%s2374_s26 + $0xa58] sm:$0xff]  ;;  %v330_v24 = vld [vmem:[%s2374_s26 + $0x320] sm:$0xff] }
  0xf6   : > { %v1088_v42 = vmul.f32 %v2999_v31, %v323_v29 }
  0xf7   : > { %v1590_v59 = vadd.f32 %v1589_v51, %v1081_v41  ;;  %v3006_v41 = vld [vmem:[%s2380_s28 + $0x2f0] sm:$0xff]  ;;  %v1829_v47 = vadd.f32 %v1828_v38, %v1321_v25  ;;  %v1324_v51 = vmul.f32 %v2866_v40, %v559_v28  ;;  %v562_v40 = vld [vmem:[%s2374_s26 + $0xa60] sm:$0xff]  ;;  %v331_v28 = vld [vmem:[%s2374_s26 + $0x328] sm:$0xff] }
  0xf8   : > { %v1089_v4 = vmul.f32 %v3006_v41, %v324_v39 }
  0xf9   : > { %v1591_v5 = vadd.f32 %v1590_v59, %v1082_v3  ;;  %v3013_v3 = vld [vmem:[%s2380_s28 + $0x2f8] sm:$0xff]  ;;  %v1830_v54 = vadd.f32 %v1829_v47, %v1322_v35  ;;  %v1325_v59 = vmul.f32 %v2873_v44, %v560_v32  ;;  %v563_v44 = vld [vmem:[%s2374_s26 + $0xa68] sm:$0xff]  ;;  %v332_v32 = vld [vmem:[%s2374_s26 + $0x330] sm:$0xff] }
  0xfa   : > { %v1090_v58 = vmul.f32 %v3013_v3, %v325_v49 }
  0xfb   : > { %v1592_v15 = vadd.f32 %v1591_v5, %v1083_v8  ;;  %v3020_v8 = vld [vmem:[%s2380_s28 + $0x300] sm:$0xff]  ;;  %v1831_v62 = vadd.f32 %v1830_v54, %v1323_v45  ;;  %v1326_v5 = vmul.f32 %v2880_v48, %v561_v36  ;;  %v564_v48 = vld [vmem:[%s2374_s26 + $0xa70] sm:$0xff]  ;;  %v333_v36 = vld [vmem:[%s2374_s26 + $0x338] sm:$0xff] }
  0xfc   : > { %v1091_v2 = vmul.f32 %v3020_v8, %v326_v55 }
  0xfd   : > { %v1593_v26 = vadd.f32 %v1592_v15, %v1084_v1  ;;  %v3027_v1 = vld [vmem:[%s2380_s28 + $0x308] sm:$0xff]  ;;  %v1832_v9 = vadd.f32 %v1831_v62, %v1324_v51  ;;  %v1327_v15 = vmul.f32 %v2887_v52, %v562_v40  ;;  %v565_v52 = vld [vmem:[%s2374_s26 + $0xa78] sm:$0xff]  ;;  %v334_v40 = vld [vmem:[%s2374_s26 + $0x340] sm:$0xff] }
  0xfe   : > { %v1092_v14 = vmul.f32 %v3027_v1, %v327_v12 }
  0xff   : > { %v1594_v37 = vadd.f32 %v1593_v26, %v1085_v13  ;;  %v3034_v13 = vld [vmem:[%s2380_s28 + $0x310] sm:$0xff]  ;;  %v1833_v19 = vadd.f32 %v1832_v9, %v1325_v59  ;;  %v1328_v26 = vmul.f32 %v2894_v56, %v563_v44  ;;  %v566_v56 = vld [vmem:[%s2374_s26 + $0xa80] sm:$0xff]  ;;  %v335_v44 = vld [vmem:[%s2374_s26 + $0x348] sm:$0xff] }
 0x100   : > { %v1093_v25 = vmul.f32 %v3034_v13, %v328_v16 }
 0x101   : > { %v1595_v46 = vadd.f32 %v1594_v37, %v1086_v23  ;;  %v3041_v23 = vld [vmem:[%s2380_s28 + $0x318] sm:$0xff]  ;;  %v1834_v29 = vadd.f32 %v1833_v19, %v1326_v5  ;;  %v1329_v37 = vmul.f32 %v2901_v60, %v564_v48  ;;  %v567_v60 = vld [vmem:[%s2374_s26 + $0xa88] sm:$0xff]  ;;  %v336_v48 = vld [vmem:[%s2374_s26 + $0x350] sm:$0xff] }
 0x102   : > { %v1094_v35 = vmul.f32 %v3041_v23, %v329_v20 }
 0x103   : > { %v1596_v53 = vadd.f32 %v1595_v46, %v1087_v33  ;;  %v3048_v33 = vld [vmem:[%s2380_s28 + $0x320] sm:$0xff]  ;;  %v1835_v39 = vadd.f32 %v1834_v29, %v1327_v15  ;;  %v1330_v46 = vmul.f32 %v2908_v0, %v565_v52  ;;  %v568_v0 = vld [vmem:[%s2374_s26 + $0xa90] sm:$0xff]  ;;  %v337_v52 = vld [vmem:[%s2374_s26 + $0x358] sm:$0xff] }
 0x104   : > { %v1095_v45 = vmul.f32 %v3048_v33, %v330_v24 }
 0x105   : > { %v1597_v61 = vadd.f32 %v1596_v53, %v1088_v42  ;;  %v3055_v42 = vld [vmem:[%s2380_s28 + $0x328] sm:$0xff]  ;;  %v1836_v49 = vadd.f32 %v1835_v39, %v1328_v26  ;;  %v1331_v53 = vmul.f32 %v2915_v6, %v566_v56  ;;  %v569_v6 = vld [vmem:[%s2374_s26 + $0xa98] sm:$0xff]  ;;  %v338_v56 = vld [vmem:[%s2374_s26 + $0x360] sm:$0xff] }
 0x106   : > { %v1096_v51 = vmul.f32 %v3055_v42, %v331_v28 }
 0x107   : > { %v1598_v7 = vadd.f32 %v1597_v61, %v1089_v4  ;;  %v3062_v4 = vld [vmem:[%s2380_s28 + $0x330] sm:$0xff]  ;;  %v1837_v55 = vadd.f32 %v1836_v49, %v1329_v37  ;;  %v1332_v61 = vmul.f32 %v2922_v11, %v567_v60  ;;  %v570_v11 = vld [vmem:[%s2374_s26 + $0xaa0] sm:$0xff]  ;;  %v339_v60 = vld [vmem:[%s2374_s26 + $0x368] sm:$0xff] }
 0x108   : > { %v1097_v59 = vmul.f32 %v3062_v4, %v332_v32 }
 0x109   : > { %v1599_v18 = vadd.f32 %v1598_v7, %v1090_v58  ;;  %v3069_v58 = vld [vmem:[%s2380_s28 + $0x338] sm:$0xff]  ;;  %v1838_v12 = vadd.f32 %v1837_v55, %v1330_v46  ;;  %v1333_v7 = vmul.f32 %v2929_v17, %v568_v0  ;;  %v571_v17 = vld [vmem:[%s2374_s26 + $0xaa8] sm:$0xff]  ;;  %v340_v0 = vld [vmem:[%s2374_s26 + $0x370] sm:$0xff] }
 0x10a   : > { %v1098_v5 = vmul.f32 %v3069_v58, %v333_v36 }
 0x10b   : > { %v1600_v27 = vadd.f32 %v1599_v18, %v1091_v2  ;;  %v3076_v2 = vld [vmem:[%s2380_s28 + $0x340] sm:$0xff]  ;;  %v1839_v16 = vadd.f32 %v1838_v12, %v1331_v53  ;;  %v1334_v18 = vmul.f32 %v2936_v22, %v569_v6  ;;  %v572_v22 = vld [vmem:[%s2374_s26 + $0xab0] sm:$0xff]  ;;  %v341_v6 = vld [vmem:[%s2374_s26 + $0x378] sm:$0xff] }
 0x10c   : > { %v1099_v15 = vmul.f32 %v3076_v2, %v334_v40 }
 0x10d   : > { %v1601_v38 = vadd.f32 %v1600_v27, %v1092_v14  ;;  %v3083_v14 = vld [vmem:[%s2380_s28 + $0x348] sm:$0xff]  ;;  %v1840_v20 = vadd.f32 %v1839_v16, %v1332_v61  ;;  %v1335_v27 = vmul.f32 %v2943_v30, %v570_v11  ;;  %v573_v30 = vld [vmem:[%s2374_s26 + $0xab8] sm:$0xff]  ;;  %v342_v11 = vld [vmem:[%s2374_s26 + $0x380] sm:$0xff] }
 0x10e   : > { %v1100_v26 = vmul.f32 %v3083_v14, %v335_v44 }
 0x10f   : > { %v1602_v47 = vadd.f32 %v1601_v38, %v1093_v25  ;;  %v3090_v25 = vld [vmem:[%s2380_s28 + $0x350] sm:$0xff]  ;;  %v1841_v24 = vadd.f32 %v1840_v20, %v1333_v7  ;;  %v1336_v38 = vmul.f32 %v2950_v34, %v571_v17  ;;  %v574_v34 = vld [vmem:[%s2374_s26 + $0xac0] sm:$0xff]  ;;  %v343_v17 = vld [vmem:[%s2374_s26 + $0x388] sm:$0xff] }
 0x110   : > { %v1101_v37 = vmul.f32 %v3090_v25, %v336_v48 }
 0x111   : > { %v1603_v54 = vadd.f32 %v1602_v47, %v1094_v35  ;;  %v3097_v35 = vld [vmem:[%s2380_s28 + $0x358] sm:$0xff]  ;;  %v1842_v28 = vadd.f32 %v1841_v24, %v1334_v18  ;;  %v1337_v47 = vmul.f32 %v2957_v43, %v572_v22  ;;  %v575_v43 = vld [vmem:[%s2374_s26 + $0xac8] sm:$0xff]  ;;  %v344_v22 = vld [vmem:[%s2374_s26 + $0x390] sm:$0xff] }
 0x112   : > { %v1102_v46 = vmul.f32 %v3097_v35, %v337_v52 }
 0x113   : > { %v1604_v62 = vadd.f32 %v1603_v54, %v1095_v45  ;;  %v3104_v45 = vld [vmem:[%s2380_s28 + $0x360] sm:$0xff]  ;;  %v1843_v32 = vadd.f32 %v1842_v28, %v1335_v27  ;;  %v1338_v54 = vmul.f32 %v2964_v50, %v573_v30  ;;  %v576_v50 = vld [vmem:[%s2374_s26 + $0xad0] sm:$0xff]  ;;  %v345_v30 = vld [vmem:[%s2374_s26 + $0x398] sm:$0xff] }
 0x114   : > { %v1103_v53 = vmul.f32 %v3104_v45, %v338_v56 }
 0x115   : > { %v1605_v9 = vadd.f32 %v1604_v62, %v1096_v51  ;;  %v3111_v51 = vld [vmem:[%s2380_s28 + $0x368] sm:$0xff]  ;;  %v1844_v36 = vadd.f32 %v1843_v32, %v1336_v38  ;;  %v1339_v62 = vmul.f32 %v2971_v57, %v574_v34  ;;  %v577_v57 = vld [vmem:[%s2374_s26 + $0xad8] sm:$0xff]  ;;  %v346_v34 = vld [vmem:[%s2374_s26 + $0x3a0] sm:$0xff] }
 0x116   : > { %v1104_v61 = vmul.f32 %v3111_v51, %v339_v60 }
 0x117   : > { %v1606_v19 = vadd.f32 %v1605_v9, %v1097_v59  ;;  %v3118_v59 = vld [vmem:[%s2380_s28 + $0x370] sm:$0xff]  ;;  %v1845_v40 = vadd.f32 %v1844_v36, %v1337_v47  ;;  %v1340_v9 = vmul.f32 %v2978_v63, %v575_v43  ;;  %v578_v63 = vld [vmem:[%s2374_s26 + $0xae0] sm:$0xff]  ;;  %v347_v43 = vld [vmem:[%s2374_s26 + $0x3a8] sm:$0xff] }
 0x118   : > { %v1105_v7 = vmul.f32 %v3118_v59, %v340_v0 }
 0x119   : > { %v1607_v29 = vadd.f32 %v1606_v19, %v1098_v5  ;;  %v3125_v5 = vld [vmem:[%s2380_s28 + $0x378] sm:$0xff]  ;;  %v1846_v44 = vadd.f32 %v1845_v40, %v1338_v54  ;;  %v1341_v19 = vmul.f32 %v2985_v10, %v576_v50  ;;  %v579_v10 = vld [vmem:[%s2374_s26 + $0xae8] sm:$0xff]  ;;  %v348_v50 = vld [vmem:[%s2374_s26 + $0x3b0] sm:$0xff] }
 0x11a   : > { %v1106_v18 = vmul.f32 %v3125_v5, %v341_v6 }
 0x11b   : > { %v1608_v39 = vadd.f32 %v1607_v29, %v1099_v15  ;;  %v3132_v15 = vld [vmem:[%s2380_s28 + $0x380] sm:$0xff]  ;;  %v1847_v48 = vadd.f32 %v1846_v44, %v1339_v62  ;;  %v1342_v29 = vmul.f32 %v2992_v21, %v577_v57  ;;  %v580_v21 = vld [vmem:[%s2374_s26 + $0xaf0] sm:$0xff]  ;;  %v349_v57 = vld [vmem:[%s2374_s26 + $0x3b8] sm:$0xff] }
 0x11c   : > { %v1107_v27 = vmul.f32 %v3132_v15, %v342_v11 }
 0x11d   : > { %v1609_v49 = vadd.f32 %v1608_v39, %v1100_v26  ;;  %v3139_v26 = vld [vmem:[%s2380_s28 + $0x388] sm:$0xff]  ;;  %v1848_v52 = vadd.f32 %v1847_v48, %v1340_v9  ;;  %v1343_v39 = vmul.f32 %v2999_v31, %v578_v63  ;;  %v581_v31 = vld [vmem:[%s2374_s26 + $0xaf8] sm:$0xff]  ;;  %v350_v63 = vld [vmem:[%s2374_s26 + $0x3c0] sm:$0xff] }
 0x11e   : > { %v1108_v38 = vmul.f32 %v3139_v26, %v343_v17 }
 0x11f   : > { %v1610_v55 = vadd.f32 %v1609_v49, %v1101_v37  ;;  %v3146_v37 = vld [vmem:[%s2380_s28 + $0x390] sm:$0xff]  ;;  %v1849_v56 = vadd.f32 %v1848_v52, %v1341_v19  ;;  %v1344_v49 = vmul.f32 %v3006_v41, %v579_v10  ;;  %v582_v41 = vld [vmem:[%s2374_s26 + $0xb00] sm:$0xff]  ;;  %v351_v10 = vld [vmem:[%s2374_s26 + $0x3c8] sm:$0xff] }
 0x120   : > { %v1109_v47 = vmul.f32 %v3146_v37, %v344_v22 }
 0x121   : > { %v1611_v12 = vadd.f32 %v1610_v55, %v1102_v46  ;;  %v3153_v46 = vld [vmem:[%s2380_s28 + $0x398] sm:$0xff]  ;;  %v1850_v60 = vadd.f32 %v1849_v56, %v1342_v29  ;;  %v1345_v55 = vmul.f32 %v3013_v3, %v580_v21  ;;  %v583_v3 = vld [vmem:[%s2374_s26 + $0xb08] sm:$0xff]  ;;  %v352_v21 = vld [vmem:[%s2374_s26 + $0x3d0] sm:$0xff] }
 0x122   : > { %v1110_v54 = vmul.f32 %v3153_v46, %v345_v30 }
 0x123   : > { %v1612_v16 = vadd.f32 %v1611_v12, %v1103_v53  ;;  %v3160_v53 = vld [vmem:[%s2380_s28 + $0x3a0] sm:$0xff]  ;;  %v1851_v0 = vadd.f32 %v1850_v60, %v1343_v39  ;;  %v1346_v12 = vmul.f32 %v3020_v8, %v581_v31  ;;  %v584_v8 = vld [vmem:[%s2374_s26 + $0xb10] sm:$0xff]  ;;  %v353_v31 = vld [vmem:[%s2374_s26 + $0x3d8] sm:$0xff] }
 0x124   : > { %v1111_v62 = vmul.f32 %v3160_v53, %v346_v34 }
 0x125   : > { %v1613_v20 = vadd.f32 %v1612_v16, %v1104_v61  ;;  %v3167_v61 = vld [vmem:[%s2380_s28 + $0x3a8] sm:$0xff]  ;;  %v1852_v6 = vadd.f32 %v1851_v0, %v1344_v49  ;;  %v1347_v16 = vmul.f32 %v3027_v1, %v582_v41  ;;  %v585_v1 = vld [vmem:[%s2374_s26 + $0xb18] sm:$0xff]  ;;  %v354_v41 = vld [vmem:[%s2374_s26 + $0x3e0] sm:$0xff] }
 0x126   : > { %v1112_v9 = vmul.f32 %v3167_v61, %v347_v43 }
 0x127   : > { %v1614_v24 = vadd.f32 %v1613_v20, %v1105_v7  ;;  %v3174_v7 = vld [vmem:[%s2380_s28 + $0x3b0] sm:$0xff]  ;;  %v1853_v11 = vadd.f32 %v1852_v6, %v1345_v55  ;;  %v1348_v20 = vmul.f32 %v3034_v13, %v583_v3  ;;  %v586_v13 = vld [vmem:[%s2374_s26 + $0xb20] sm:$0xff]  ;;  %v355_v3 = vld [vmem:[%s2374_s26 + $0x3e8] sm:$0xff] }
 0x128   : > { %v1113_v19 = vmul.f32 %v3174_v7, %v348_v50 }
 0x129   : > { %v1615_v28 = vadd.f32 %v1614_v24, %v1106_v18  ;;  %v3181_v18 = vld [vmem:[%s2380_s28 + $0x3b8] sm:$0xff]  ;;  %v1854_v17 = vadd.f32 %v1853_v11, %v1346_v12  ;;  %v1349_v24 = vmul.f32 %v3041_v23, %v584_v8  ;;  %v587_v23 = vld [vmem:[%s2374_s26 + $0xb28] sm:$0xff]  ;;  %v356_v8 = vld [vmem:[%s2374_s26 + $0x3f0] sm:$0xff] }
 0x12a   : > { %v1114_v29 = vmul.f32 %v3181_v18, %v349_v57 }
 0x12b   : > { %v1616_v32 = vadd.f32 %v1615_v28, %v1107_v27  ;;  %v3188_v27 = vld [vmem:[%s2380_s28 + $0x3c0] sm:$0xff]  ;;  %v1855_v22 = vadd.f32 %v1854_v17, %v1347_v16  ;;  %v1350_v28 = vmul.f32 %v3048_v33, %v585_v1  ;;  %v588_v33 = vld [vmem:[%s2374_s26 + $0xb30] sm:$0xff]  ;;  %v357_v1 = vld [vmem:[%s2374_s26 + $0x3f8] sm:$0xff] }
 0x12c   : > { %v1115_v39 = vmul.f32 %v3188_v27, %v350_v63 }
 0x12d   : > { %v1617_v36 = vadd.f32 %v1616_v32, %v1108_v38  ;;  %v3195_v38 = vld [vmem:[%s2380_s28 + $0x3c8] sm:$0xff]  ;;  %v1856_v30 = vadd.f32 %v1855_v22, %v1348_v20  ;;  %v1351_v32 = vmul.f32 %v3055_v42, %v586_v13  ;;  %v589_v42 = vld [vmem:[%s2374_s26 + $0xb38] sm:$0xff]  ;;  %v358_v13 = vld [vmem:[%s2374_s26 + $0x400] sm:$0xff] }
 0x12e   : > { %v1116_v49 = vmul.f32 %v3195_v38, %v351_v10 }
 0x12f   : > { %v1618_v40 = vadd.f32 %v1617_v36, %v1109_v47  ;;  %v3202_v47 = vld [vmem:[%s2380_s28 + $0x3d0] sm:$0xff]  ;;  %v1857_v34 = vadd.f32 %v1856_v30, %v1349_v24  ;;  %v1352_v36 = vmul.f32 %v3062_v4, %v587_v23  ;;  %v590_v4 = vld [vmem:[%s2374_s26 + $0xb40] sm:$0xff]  ;;  %v359_v23 = vld [vmem:[%s2374_s26 + $0x408] sm:$0xff] }
 0x130   : > { %v1117_v55 = vmul.f32 %v3202_v47, %v352_v21 }
 0x131   : > { %v1619_v44 = vadd.f32 %v1618_v40, %v1110_v54  ;;  %v3209_v54 = vld [vmem:[%s2380_s28 + $0x3d8] sm:$0xff]  ;;  %v1858_v43 = vadd.f32 %v1857_v34, %v1350_v28  ;;  %v1353_v40 = vmul.f32 %v3069_v58, %v588_v33  ;;  %v591_v58 = vld [vmem:[%s2374_s26 + $0xb48] sm:$0xff]  ;;  %v360_v33 = vld [vmem:[%s2374_s26 + $0x410] sm:$0xff] }
 0x132   : > { %v1118_v12 = vmul.f32 %v3209_v54, %v353_v31 }
 0x133   : > { %v1620_v48 = vadd.f32 %v1619_v44, %v1111_v62  ;;  %v3216_v62 = vld [vmem:[%s2380_s28 + $0x3e0] sm:$0xff]  ;;  %v1859_v50 = vadd.f32 %v1858_v43, %v1351_v32  ;;  %v1354_v44 = vmul.f32 %v3076_v2, %v589_v42  ;;  %v592_v2 = vld [vmem:[%s2374_s26 + $0xb50] sm:$0xff]  ;;  %v361_v42 = vld [vmem:[%s2374_s26 + $0x418] sm:$0xff] }
 0x134   : > { %v1119_v16 = vmul.f32 %v3216_v62, %v354_v41 }
 0x135   : > { %v1621_v52 = vadd.f32 %v1620_v48, %v1112_v9  ;;  %v3223_v9 = vld [vmem:[%s2380_s28 + $0x3e8] sm:$0xff]  ;;  %v1860_v57 = vadd.f32 %v1859_v50, %v1352_v36  ;;  %v1355_v48 = vmul.f32 %v3083_v14, %v590_v4  ;;  %v593_v14 = vld [vmem:[%s2374_s26 + $0xb58] sm:$0xff]  ;;  %v362_v4 = vld [vmem:[%s2374_s26 + $0x420] sm:$0xff] }
 0x136   : > { %v1120_v20 = vmul.f32 %v3223_v9, %v355_v3 }
 0x137   : > { %v1622_v56 = vadd.f32 %v1621_v52, %v1113_v19  ;;  %v3230_v19 = vld [vmem:[%s2380_s28 + $0x3f0] sm:$0xff]  ;;  %v1861_v63 = vadd.f32 %v1860_v57, %v1353_v40  ;;  %v1356_v52 = vmul.f32 %v3090_v25, %v591_v58  ;;  %v594_v25 = vld [vmem:[%s2374_s26 + $0xb60] sm:$0xff]  ;;  %v363_v58 = vld [vmem:[%s2374_s26 + $0x428] sm:$0xff] }
 0x138   : > { %v1121_v24 = vmul.f32 %v3230_v19, %v356_v8 }
 0x139   : > { %v1623_v60 = vadd.f32 %v1622_v56, %v1114_v29  ;;  %v3237_v29 = vld [vmem:[%s2380_s28 + $0x3f8] sm:$0xff]  ;;  %v1862_v10 = vadd.f32 %v1861_v63, %v1354_v44  ;;  %v1357_v56 = vmul.f32 %v3097_v35, %v592_v2  ;;  %v595_v35 = vld [vmem:[%s2374_s26 + $0xb68] sm:$0xff]  ;;  %v364_v2 = vld [vmem:[%s2374_s26 + $0x430] sm:$0xff] }
 0x13a   : > { %v1122_v28 = vmul.f32 %v3237_v29, %v357_v1 }
 0x13b   : > { %v1624_v0 = vadd.f32 %v1623_v60, %v1115_v39  ;;  %v3244_v39 = vld [vmem:[%s2380_s28 + $0x400] sm:$0xff]  ;;  %v1863_v21 = vadd.f32 %v1862_v10, %v1355_v48  ;;  %v1358_v60 = vmul.f32 %v3104_v45, %v593_v14  ;;  %v596_v45 = vld [vmem:[%s2374_s26 + $0xb70] sm:$0xff]  ;;  %v365_v14 = vld [vmem:[%s2374_s26 + $0x438] sm:$0xff] }
 0x13c   : > { %v1123_v32 = vmul.f32 %v3244_v39, %v358_v13 }
 0x13d   : > { %v1625_v6 = vadd.f32 %v1624_v0, %v1116_v49  ;;  %v3251_v49 = vld [vmem:[%s2380_s28 + $0x408] sm:$0xff]  ;;  %v1864_v31 = vadd.f32 %v1863_v21, %v1356_v52  ;;  %v1359_v0 = vmul.f32 %v3111_v51, %v594_v25  ;;  %v597_v51 = vld [vmem:[%s2374_s26 + $0xb78] sm:$0xff]  ;;  %v366_v25 = vld [vmem:[%s2374_s26 + $0x440] sm:$0xff] }
 0x13e   : > { %v1124_v36 = vmul.f32 %v3251_v49, %v359_v23 }
 0x13f   : > { %v1626_v11 = vadd.f32 %v1625_v6, %v1117_v55  ;;  %v3258_v55 = vld [vmem:[%s2380_s28 + $0x410] sm:$0xff]  ;;  %v1865_v41 = vadd.f32 %v1864_v31, %v1357_v56  ;;  %v1360_v6 = vmul.f32 %v3118_v59, %v595_v35  ;;  %v598_v59 = vld [vmem:[%s2374_s26 + $0xb80] sm:$0xff]  ;;  %v367_v35 = vld [vmem:[%s2374_s26 + $0x448] sm:$0xff] }
 0x140   : > { %v1125_v40 = vmul.f32 %v3258_v55, %v360_v33 }
 0x141   : > { %v1627_v17 = vadd.f32 %v1626_v11, %v1118_v12  ;;  %v3265_v12 = vld [vmem:[%s2380_s28 + $0x418] sm:$0xff]  ;;  %v1866_v3 = vadd.f32 %v1865_v41, %v1358_v60  ;;  %v1361_v11 = vmul.f32 %v3125_v5, %v596_v45  ;;  %v599_v5 = vld [vmem:[%s2374_s26 + $0xb88] sm:$0xff]  ;;  %v368_v45 = vld [vmem:[%s2374_s26 + $0x450] sm:$0xff] }
 0x142   : > { %v1126_v44 = vmul.f32 %v3265_v12, %v361_v42 }
 0x143   : > { %v1628_v22 = vadd.f32 %v1627_v17, %v1119_v16  ;;  %v3272_v16 = vld [vmem:[%s2380_s28 + $0x420] sm:$0xff]  ;;  %v1867_v8 = vadd.f32 %v1866_v3, %v1359_v0  ;;  %v1362_v17 = vmul.f32 %v3132_v15, %v597_v51  ;;  %v600_v15 = vld [vmem:[%s2374_s26 + $0xb90] sm:$0xff]  ;;  %v369_v51 = vld [vmem:[%s2374_s26 + $0x458] sm:$0xff] }
 0x144   : > { %v1127_v48 = vmul.f32 %v3272_v16, %v362_v4 }
 0x145   : > { %v1629_v30 = vadd.f32 %v1628_v22, %v1120_v20  ;;  %v3279_v20 = vld [vmem:[%s2380_s28 + $0x428] sm:$0xff]  ;;  %v1868_v1 = vadd.f32 %v1867_v8, %v1360_v6  ;;  %v1363_v22 = vmul.f32 %v3139_v26, %v598_v59  ;;  %v601_v26 = vld [vmem:[%s2374_s26 + $0xb98] sm:$0xff]  ;;  %v370_v59 = vld [vmem:[%s2374_s26 + $0x460] sm:$0xff] }
 0x146   : > { %v1128_v52 = vmul.f32 %v3279_v20, %v363_v58 }
 0x147   : > { %v1630_v34 = vadd.f32 %v1629_v30, %v1121_v24  ;;  %v3286_v24 = vld [vmem:[%s2380_s28 + $0x430] sm:$0xff]  ;;  %v1869_v13 = vadd.f32 %v1868_v1, %v1361_v11  ;;  %v1364_v30 = vmul.f32 %v3146_v37, %v599_v5  ;;  %v602_v37 = vld [vmem:[%s2374_s26 + $0xba0] sm:$0xff]  ;;  %v371_v5 = vld [vmem:[%s2374_s26 + $0x468] sm:$0xff] }
 0x148   : > { %v1129_v56 = vmul.f32 %v3286_v24, %v364_v2 }
 0x149   : > { %v1631_v43 = vadd.f32 %v1630_v34, %v1122_v28  ;;  %v3293_v28 = vld [vmem:[%s2380_s28 + $0x438] sm:$0xff]  ;;  %v1870_v23 = vadd.f32 %v1869_v13, %v1362_v17  ;;  %v1365_v34 = vmul.f32 %v3153_v46, %v600_v15  ;;  %v603_v46 = vld [vmem:[%s2374_s26 + $0xba8] sm:$0xff]  ;;  %v372_v15 = vld [vmem:[%s2374_s26 + $0x470] sm:$0xff] }
 0x14a   : > { %v1130_v60 = vmul.f32 %v3293_v28, %v365_v14 }
 0x14b   : > { %v1632_v50 = vadd.f32 %v1631_v43, %v1123_v32  ;;  %v3300_v32 = vld [vmem:[%s2380_s28 + $0x440] sm:$0xff]  ;;  %v1871_v33 = vadd.f32 %v1870_v23, %v1363_v22  ;;  %v1366_v43 = vmul.f32 %v3160_v53, %v601_v26  ;;  %v604_v53 = vld [vmem:[%s2374_s26 + $0xbb0] sm:$0xff]  ;;  %v373_v26 = vld [vmem:[%s2374_s26 + $0x478] sm:$0xff] }
 0x14c   : > { %v1131_v0 = vmul.f32 %v3300_v32, %v366_v25 }
 0x14d   : > { %v1633_v57 = vadd.f32 %v1632_v50, %v1124_v36  ;;  %v3307_v36 = vld [vmem:[%s2380_s28 + $0x448] sm:$0xff]  ;;  %v1872_v42 = vadd.f32 %v1871_v33, %v1364_v30  ;;  %v1367_v50 = vmul.f32 %v3167_v61, %v602_v37  ;;  %v605_v61 = vld [vmem:[%s2374_s26 + $0xbb8] sm:$0xff]  ;;  %v374_v37 = vld [vmem:[%s2374_s26 + $0x480] sm:$0xff] }
 0x14e   : > { %v1132_v6 = vmul.f32 %v3307_v36, %v367_v35 }
 0x14f   : > { %v1634_v63 = vadd.f32 %v1633_v57, %v1125_v40  ;;  %v3314_v40 = vld [vmem:[%s2380_s28 + $0x450] sm:$0xff]  ;;  %v1873_v4 = vadd.f32 %v1872_v42, %v1365_v34  ;;  %v1368_v57 = vmul.f32 %v3174_v7, %v603_v46  ;;  %v606_v7 = vld [vmem:[%s2374_s26 + $0xbc0] sm:$0xff]  ;;  %v375_v46 = vld [vmem:[%s2374_s26 + $0x488] sm:$0xff] }
 0x150   : > { %v1133_v11 = vmul.f32 %v3314_v40, %v368_v45 }
 0x151   : > { %v1635_v10 = vadd.f32 %v1634_v63, %v1126_v44  ;;  %v3321_v44 = vld [vmem:[%s2380_s28 + $0x458] sm:$0xff]  ;;  %v1874_v58 = vadd.f32 %v1873_v4, %v1366_v43  ;;  %v1369_v63 = vmul.f32 %v3181_v18, %v604_v53  ;;  %v607_v18 = vld [vmem:[%s2374_s26 + $0xbc8] sm:$0xff]  ;;  %v376_v53 = vld [vmem:[%s2374_s26 + $0x490] sm:$0xff] }
 0x152   : > { %v1134_v17 = vmul.f32 %v3321_v44, %v369_v51 }
 0x153   : > { %v1636_v21 = vadd.f32 %v1635_v10, %v1127_v48  ;;  %v3328_v48 = vld [vmem:[%s2380_s28 + $0x460] sm:$0xff]  ;;  %v1875_v2 = vadd.f32 %v1874_v58, %v1367_v50  ;;  %v1370_v10 = vmul.f32 %v3188_v27, %v605_v61  ;;  %v608_v27 = vld [vmem:[%s2374_s26 + $0xbd0] sm:$0xff]  ;;  %v377_v61 = vld [vmem:[%s2374_s26 + $0x498] sm:$0xff] }
 0x154   : > { %v1135_v22 = vmul.f32 %v3328_v48, %v370_v59 }
 0x155   : > { %v1637_v31 = vadd.f32 %v1636_v21, %v1128_v52  ;;  %v3335_v52 = vld [vmem:[%s2380_s28 + $0x468] sm:$0xff]  ;;  %v1876_v14 = vadd.f32 %v1875_v2, %v1368_v57  ;;  %v1371_v21 = vmul.f32 %v3195_v38, %v606_v7  ;;  %v609_v38 = vld [vmem:[%s2374_s26 + $0xbd8] sm:$0xff]  ;;  %v378_v7 = vld [vmem:[%s2374_s26 + $0x4a0] sm:$0xff] }
 0x156   : > { %v1136_v30 = vmul.f32 %v3335_v52, %v371_v5 }
 0x157   : > { %v1638_v41 = vadd.f32 %v1637_v31, %v1129_v56  ;;  %v3342_v56 = vld [vmem:[%s2380_s28 + $0x470] sm:$0xff]  ;;  %v1877_v25 = vadd.f32 %v1876_v14, %v1369_v63  ;;  %v1372_v31 = vmul.f32 %v3202_v47, %v607_v18  ;;  %v610_v47 = vld [vmem:[%s2374_s26 + $0xbe0] sm:$0xff]  ;;  %v379_v18 = vld [vmem:[%s2374_s26 + $0x4a8] sm:$0xff] }
 0x158   : > { %v1137_v34 = vmul.f32 %v3342_v56, %v372_v15 }
 0x159   : > { %v1639_v3 = vadd.f32 %v1638_v41, %v1130_v60  ;;  %v3349_v60 = vld [vmem:[%s2380_s28 + $0x478] sm:$0xff]  ;;  %v1878_v35 = vadd.f32 %v1877_v25, %v1370_v10  ;;  %v1373_v41 = vmul.f32 %v3209_v54, %v608_v27  ;;  %v611_v54 = vld [vmem:[%s2374_s26 + $0xbe8] sm:$0xff]  ;;  %v380_v27 = vld [vmem:[%s2374_s26 + $0x4b0] sm:$0xff] }
 0x15a   : > { %v1138_v43 = vmul.f32 %v3349_v60, %v373_v26 }
 0x15b   : > { %v1640_v8 = vadd.f32 %v1639_v3, %v1131_v0  ;;  %v3356_v0 = vld [vmem:[%s2380_s28 + $0x480] sm:$0xff]  ;;  %v1879_v45 = vadd.f32 %v1878_v35, %v1371_v21  ;;  %v1374_v3 = vmul.f32 %v3216_v62, %v609_v38  ;;  %v612_v62 = vld [vmem:[%s2374_s26 + $0xbf0] sm:$0xff]  ;;  %v381_v38 = vld [vmem:[%s2374_s26 + $0x4b8] sm:$0xff] }
 0x15c   : > { %v1139_v50 = vmul.f32 %v3356_v0, %v374_v37 }
 0x15d   : > { %v1641_v1 = vadd.f32 %v1640_v8, %v1132_v6  ;;  %v3363_v6 = vld [vmem:[%s2380_s28 + $0x488] sm:$0xff]  ;;  %v1880_v51 = vadd.f32 %v1879_v45, %v1372_v31  ;;  %v1375_v8 = vmul.f32 %v3223_v9, %v610_v47  ;;  %v613_v9 = vld [vmem:[%s2374_s26 + $0xbf8] sm:$0xff]  ;;  %v382_v47 = vld [vmem:[%s2374_s26 + $0x4c0] sm:$0xff] }
 0x15e   : > { %v1140_v57 = vmul.f32 %v3363_v6, %v375_v46 }
 0x15f   : > { %v1642_v13 = vadd.f32 %v1641_v1, %v1133_v11  ;;  %v3370_v11 = vld [vmem:[%s2380_s28 + $0x490] sm:$0xff]  ;;  %v1881_v59 = vadd.f32 %v1880_v51, %v1373_v41  ;;  %v1376_v1 = vmul.f32 %v3230_v19, %v611_v54  ;;  %v614_v19 = vld [vmem:[%s2374_s26 + $0xc00] sm:$0xff]  ;;  %v383_v54 = vld [vmem:[%s2374_s26 + $0x4c8] sm:$0xff] }
 0x160   : > { %v1141_v63 = vmul.f32 %v3370_v11, %v376_v53 }
 0x161   : > { %v1643_v23 = vadd.f32 %v1642_v13, %v1134_v17  ;;  %v3377_v17 = vld [vmem:[%s2380_s28 + $0x498] sm:$0xff]  ;;  %v1882_v5 = vadd.f32 %v1881_v59, %v1374_v3  ;;  %v1377_v13 = vmul.f32 %v3237_v29, %v612_v62  ;;  %v615_v29 = vld [vmem:[%s2374_s26 + $0xc08] sm:$0xff]  ;;  %v384_v62 = vld [vmem:[%s2374_s26 + $0x4d0] sm:$0xff] }
 0x162   : > { %v1142_v10 = vmul.f32 %v3377_v17, %v377_v61 }
 0x163   : > { %v1644_v33 = vadd.f32 %v1643_v23, %v1135_v22  ;;  %v3384_v22 = vld [vmem:[%s2380_s28 + $0x4a0] sm:$0xff]  ;;  %v1883_v15 = vadd.f32 %v1882_v5, %v1375_v8  ;;  %v1378_v23 = vmul.f32 %v3244_v39, %v613_v9  ;;  %v616_v39 = vld [vmem:[%s2374_s26 + $0xc10] sm:$0xff]  ;;  %v385_v9 = vld [vmem:[%s2374_s26 + $0x4d8] sm:$0xff] }
 0x164   : > { %v1143_v21 = vmul.f32 %v3384_v22, %v378_v7 }
 0x165   : > { %v1645_v42 = vadd.f32 %v1644_v33, %v1136_v30  ;;  %v3391_v30 = vld [vmem:[%s2380_s28 + $0x4a8] sm:$0xff]  ;;  %v1884_v26 = vadd.f32 %v1883_v15, %v1376_v1  ;;  %v1379_v33 = vmul.f32 %v3251_v49, %v614_v19  ;;  %v617_v49 = vld [vmem:[%s2374_s26 + $0xc18] sm:$0xff]  ;;  %v386_v19 = vld [vmem:[%s2374_s26 + $0x4e0] sm:$0xff] }
 0x166   : > { %v1144_v31 = vmul.f32 %v3391_v30, %v379_v18 }
 0x167   : > { %v1646_v4 = vadd.f32 %v1645_v42, %v1137_v34  ;;  %v3398_v34 = vld [vmem:[%s2380_s28 + $0x4b0] sm:$0xff]  ;;  %v1885_v37 = vadd.f32 %v1884_v26, %v1377_v13  ;;  %v1380_v42 = vmul.f32 %v3258_v55, %v615_v29  ;;  %v618_v55 = vld [vmem:[%s2374_s26 + $0xc20] sm:$0xff]  ;;  %v387_v29 = vld [vmem:[%s2374_s26 + $0x4e8] sm:$0xff] }
 0x168   : > { %v1145_v41 = vmul.f32 %v3398_v34, %v380_v27 }
 0x169   : > { %v1647_v58 = vadd.f32 %v1646_v4, %v1138_v43  ;;  %v3405_v43 = vld [vmem:[%s2380_s28 + $0x4b8] sm:$0xff]  ;;  %v1886_v46 = vadd.f32 %v1885_v37, %v1378_v23  ;;  %v1381_v4 = vmul.f32 %v3265_v12, %v616_v39  ;;  %v619_v12 = vld [vmem:[%s2374_s26 + $0xc28] sm:$0xff]  ;;  %v388_v39 = vld [vmem:[%s2374_s26 + $0x4f0] sm:$0xff] }
 0x16a   : > { %v1146_v3 = vmul.f32 %v3405_v43, %v381_v38 }
 0x16b   : > { %v1648_v2 = vadd.f32 %v1647_v58, %v1139_v50  ;;  %v3412_v50 = vld [vmem:[%s2380_s28 + $0x4c0] sm:$0xff]  ;;  %v1887_v53 = vadd.f32 %v1886_v46, %v1379_v33  ;;  %v1382_v58 = vmul.f32 %v3272_v16, %v617_v49  ;;  %v620_v16 = vld [vmem:[%s2374_s26 + $0xc30] sm:$0xff]  ;;  %v389_v49 = vld [vmem:[%s2374_s26 + $0x4f8] sm:$0xff] }
 0x16c   : > { %v1147_v8 = vmul.f32 %v3412_v50, %v382_v47 }
 0x16d   : > { %v1649_v14 = vadd.f32 %v1648_v2, %v1140_v57  ;;  %v3419_v57 = vld [vmem:[%s2380_s28 + $0x4c8] sm:$0xff]  ;;  %v1888_v61 = vadd.f32 %v1887_v53, %v1380_v42  ;;  %v1383_v2 = vmul.f32 %v3279_v20, %v618_v55  ;;  %v621_v20 = vld [vmem:[%s2374_s26 + $0xc38] sm:$0xff]  ;;  %v390_v55 = vld [vmem:[%s2374_s26 + $0x500] sm:$0xff] }
 0x16e   : > { %v1148_v1 = vmul.f32 %v3419_v57, %v383_v54 }
 0x16f   : > { %v1650_v25 = vadd.f32 %v1649_v14, %v1141_v63  ;;  %v3426_v63 = vld [vmem:[%s2380_s28 + $0x4d0] sm:$0xff]  ;;  %v1889_v7 = vadd.f32 %v1888_v61, %v1381_v4  ;;  %v1384_v14 = vmul.f32 %v3286_v24, %v619_v12  ;;  %v622_v24 = vld [vmem:[%s2374_s26 + $0xc40] sm:$0xff]  ;;  %v391_v12 = vld [vmem:[%s2374_s26 + $0x508] sm:$0xff] }
 0x170   : > { %v1149_v13 = vmul.f32 %v3426_v63, %v384_v62 }
 0x171   : > { %v1651_v35 = vadd.f32 %v1650_v25, %v1142_v10  ;;  %v3433_v10 = vld [vmem:[%s2380_s28 + $0x4d8] sm:$0xff]  ;;  %v1890_v18 = vadd.f32 %v1889_v7, %v1382_v58  ;;  %v1385_v25 = vmul.f32 %v3293_v28, %v620_v16  ;;  %v623_v28 = vld [vmem:[%s2374_s26 + $0xc48] sm:$0xff]  ;;  %v392_v16 = vld [vmem:[%s2374_s26 + $0x510] sm:$0xff] }
 0x172   : > { %v1150_v23 = vmul.f32 %v3433_v10, %v385_v9 }
 0x173   : > { %v1652_v45 = vadd.f32 %v1651_v35, %v1143_v21  ;;  %v3440_v21 = vld [vmem:[%s2380_s28 + $0x4e0] sm:$0xff]  ;;  %v1891_v27 = vadd.f32 %v1890_v18, %v1383_v2  ;;  %v1386_v35 = vmul.f32 %v3300_v32, %v621_v20  ;;  %v624_v32 = vld [vmem:[%s2374_s26 + $0xc50] sm:$0xff]  ;;  %v393_v20 = vld [vmem:[%s2374_s26 + $0x518] sm:$0xff] }
 0x174   : > { %v1151_v33 = vmul.f32 %v3440_v21, %v386_v19 }
 0x175   : > { %v1653_v51 = vadd.f32 %v1652_v45, %v1144_v31  ;;  %v3447_v31 = vld [vmem:[%s2380_s28 + $0x4e8] sm:$0xff]  ;;  %v1892_v38 = vadd.f32 %v1891_v27, %v1384_v14  ;;  %v1387_v45 = vmul.f32 %v3307_v36, %v622_v24  ;;  %v625_v36 = vld [vmem:[%s2374_s26 + $0xc58] sm:$0xff]  ;;  %v394_v24 = vld [vmem:[%s2374_s26 + $0x520] sm:$0xff] }
 0x176   : > { %v1152_v42 = vmul.f32 %v3447_v31, %v387_v29 }
 0x177   : > { %v1654_v59 = vadd.f32 %v1653_v51, %v1145_v41  ;;  %v3454_v41 = vld [vmem:[%s2380_s28 + $0x4f0] sm:$0xff]  ;;  %v1893_v47 = vadd.f32 %v1892_v38, %v1385_v25  ;;  %v1388_v51 = vmul.f32 %v3314_v40, %v623_v28  ;;  %v626_v40 = vld [vmem:[%s2374_s26 + $0xc60] sm:$0xff]  ;;  %v395_v28 = vld [vmem:[%s2374_s26 + $0x528] sm:$0xff] }
 0x178   : > { %v1153_v4 = vmul.f32 %v3454_v41, %v388_v39 }
 0x179   : > { %v1655_v5 = vadd.f32 %v1654_v59, %v1146_v3  ;;  %v3461_v3 = vld [vmem:[%s2380_s28 + $0x4f8] sm:$0xff]  ;;  %v1894_v54 = vadd.f32 %v1893_v47, %v1386_v35  ;;  %v1389_v59 = vmul.f32 %v3321_v44, %v624_v32  ;;  %v627_v44 = vld [vmem:[%s2374_s26 + $0xc68] sm:$0xff]  ;;  %v396_v32 = vld [vmem:[%s2374_s26 + $0x530] sm:$0xff] }
 0x17a   : > { %v1154_v58 = vmul.f32 %v3461_v3, %v389_v49 }
 0x17b   : > { %v1656_v15 = vadd.f32 %v1655_v5, %v1147_v8  ;;  %v3468_v8 = vld [vmem:[%s2380_s28 + $0x500] sm:$0xff]  ;;  %v1895_v62 = vadd.f32 %v1894_v54, %v1387_v45  ;;  %v1390_v5 = vmul.f32 %v3328_v48, %v625_v36  ;;  %v628_v48 = vld [vmem:[%s2374_s26 + $0xc70] sm:$0xff]  ;;  %v397_v36 = vld [vmem:[%s2374_s26 + $0x538] sm:$0xff] }
 0x17c   : > { %v1155_v2 = vmul.f32 %v3468_v8, %v390_v55 }
 0x17d   : > { %v1657_v26 = vadd.f32 %v1656_v15, %v1148_v1  ;;  %v3475_v1 = vld [vmem:[%s2380_s28 + $0x508] sm:$0xff]  ;;  %v1896_v9 = vadd.f32 %v1895_v62, %v1388_v51  ;;  %v1391_v15 = vmul.f32 %v3335_v52, %v626_v40  ;;  %v629_v52 = vld [vmem:[%s2374_s26 + $0xc78] sm:$0xff]  ;;  %v398_v40 = vld [vmem:[%s2374_s26 + $0x540] sm:$0xff] }
 0x17e   : > { %v1156_v14 = vmul.f32 %v3475_v1, %v391_v12 }
 0x17f   : > { %v1658_v37 = vadd.f32 %v1657_v26, %v1149_v13  ;;  %v3482_v13 = vld [vmem:[%s2380_s28 + $0x510] sm:$0xff]  ;;  %v1897_v19 = vadd.f32 %v1896_v9, %v1389_v59  ;;  %v1392_v26 = vmul.f32 %v3342_v56, %v627_v44  ;;  %v630_v56 = vld [vmem:[%s2374_s26 + $0xc80] sm:$0xff]  ;;  %v399_v44 = vld [vmem:[%s2374_s26 + $0x548] sm:$0xff] }
 0x180   : > { %v1157_v25 = vmul.f32 %v3482_v13, %v392_v16 }
 0x181   : > { %v1659_v46 = vadd.f32 %v1658_v37, %v1150_v23  ;;  %v3489_v23 = vld [vmem:[%s2380_s28 + $0x518] sm:$0xff]  ;;  %v1898_v29 = vadd.f32 %v1897_v19, %v1390_v5  ;;  %v1393_v37 = vmul.f32 %v3349_v60, %v628_v48  ;;  %v631_v60 = vld [vmem:[%s2374_s26 + $0xc88] sm:$0xff]  ;;  %v400_v48 = vld [vmem:[%s2374_s26 + $0x550] sm:$0xff] }
 0x182   : > { %v1158_v35 = vmul.f32 %v3489_v23, %v393_v20 }
 0x183   : > { %v1660_v53 = vadd.f32 %v1659_v46, %v1151_v33  ;;  %v3496_v33 = vld [vmem:[%s2380_s28 + $0x520] sm:$0xff]  ;;  %v1899_v39 = vadd.f32 %v1898_v29, %v1391_v15  ;;  %v1394_v46 = vmul.f32 %v3356_v0, %v629_v52  ;;  %v632_v0 = vld [vmem:[%s2374_s26 + $0xc90] sm:$0xff]  ;;  %v401_v52 = vld [vmem:[%s2374_s26 + $0x558] sm:$0xff] }
 0x184   : > { %v1159_v45 = vmul.f32 %v3496_v33, %v394_v24 }
 0x185   : > { %v1661_v61 = vadd.f32 %v1660_v53, %v1152_v42  ;;  %v3503_v42 = vld [vmem:[%s2380_s28 + $0x528] sm:$0xff]  ;;  %v1900_v49 = vadd.f32 %v1899_v39, %v1392_v26  ;;  %v1395_v53 = vmul.f32 %v3363_v6, %v630_v56  ;;  %v633_v6 = vld [vmem:[%s2374_s26 + $0xc98] sm:$0xff]  ;;  %v402_v56 = vld [vmem:[%s2374_s26 + $0x560] sm:$0xff] }
 0x186   : > { %v1160_v51 = vmul.f32 %v3503_v42, %v395_v28 }
 0x187   : > { %v1662_v7 = vadd.f32 %v1661_v61, %v1153_v4  ;;  %v3510_v4 = vld [vmem:[%s2380_s28 + $0x530] sm:$0xff]  ;;  %v1901_v55 = vadd.f32 %v1900_v49, %v1393_v37  ;;  %v1396_v61 = vmul.f32 %v3370_v11, %v631_v60  ;;  %v634_v11 = vld [vmem:[%s2374_s26 + $0xca0] sm:$0xff]  ;;  %v403_v60 = vld [vmem:[%s2374_s26 + $0x568] sm:$0xff] }
 0x188   : > { %v1161_v59 = vmul.f32 %v3510_v4, %v396_v32 }
 0x189   : > { %v1663_v18 = vadd.f32 %v1662_v7, %v1154_v58  ;;  %v3517_v58 = vld [vmem:[%s2380_s28 + $0x538] sm:$0xff]  ;;  %v1902_v12 = vadd.f32 %v1901_v55, %v1394_v46  ;;  %v1397_v7 = vmul.f32 %v3377_v17, %v632_v0  ;;  %v635_v17 = vld [vmem:[%s2374_s26 + $0xca8] sm:$0xff]  ;;  %v404_v0 = vld [vmem:[%s2374_s26 + $0x570] sm:$0xff] }
 0x18a   : > { %v1162_v5 = vmul.f32 %v3517_v58, %v397_v36 }
 0x18b   : > { %v1664_v27 = vadd.f32 %v1663_v18, %v1155_v2  ;;  %v3524_v2 = vld [vmem:[%s2380_s28 + $0x540] sm:$0xff]  ;;  %v1903_v16 = vadd.f32 %v1902_v12, %v1395_v53  ;;  %v1398_v18 = vmul.f32 %v3384_v22, %v633_v6  ;;  %v636_v22 = vld [vmem:[%s2374_s26 + $0xcb0] sm:$0xff]  ;;  %v405_v6 = vld [vmem:[%s2374_s26 + $0x578] sm:$0xff] }
 0x18c   : > { %v1163_v15 = vmul.f32 %v3524_v2, %v398_v40 }
 0x18d   : > { %v1665_v38 = vadd.f32 %v1664_v27, %v1156_v14  ;;  %v3531_v14 = vld [vmem:[%s2380_s28 + $0x548] sm:$0xff]  ;;  %v1904_v20 = vadd.f32 %v1903_v16, %v1396_v61  ;;  %v1399_v27 = vmul.f32 %v3391_v30, %v634_v11  ;;  %v637_v30 = vld [vmem:[%s2374_s26 + $0xcb8] sm:$0xff]  ;;  %v406_v11 = vld [vmem:[%s2374_s26 + $0x580] sm:$0xff] }
 0x18e   : > { %v1164_v26 = vmul.f32 %v3531_v14, %v399_v44 }
 0x18f   : > { %v1666_v47 = vadd.f32 %v1665_v38, %v1157_v25  ;;  %v3538_v25 = vld [vmem:[%s2380_s28 + $0x550] sm:$0xff]  ;;  %v1905_v24 = vadd.f32 %v1904_v20, %v1397_v7  ;;  %v1400_v38 = vmul.f32 %v3398_v34, %v635_v17  ;;  %v638_v34 = vld [vmem:[%s2374_s26 + $0xcc0] sm:$0xff]  ;;  %v407_v17 = vld [vmem:[%s2374_s26 + $0x588] sm:$0xff] }
 0x190   : > { %v1165_v37 = vmul.f32 %v3538_v25, %v400_v48 }
 0x191   : > { %v1667_v54 = vadd.f32 %v1666_v47, %v1158_v35  ;;  %v3545_v35 = vld [vmem:[%s2380_s28 + $0x558] sm:$0xff]  ;;  %v1906_v28 = vadd.f32 %v1905_v24, %v1398_v18  ;;  %v1401_v47 = vmul.f32 %v3405_v43, %v636_v22  ;;  %v639_v43 = vld [vmem:[%s2374_s26 + $0xcc8] sm:$0xff]  ;;  %v408_v22 = vld [vmem:[%s2374_s26 + $0x590] sm:$0xff] }
 0x192   : > { %v1166_v46 = vmul.f32 %v3545_v35, %v401_v52 }
 0x193   : > { %v1668_v62 = vadd.f32 %v1667_v54, %v1159_v45  ;;  %v3552_v45 = vld [vmem:[%s2380_s28 + $0x560] sm:$0xff]  ;;  %v1907_v32 = vadd.f32 %v1906_v28, %v1399_v27  ;;  %v1402_v54 = vmul.f32 %v3412_v50, %v637_v30  ;;  %v640_v50 = vld [vmem:[%s2374_s26 + $0xcd0] sm:$0xff]  ;;  %v409_v30 = vld [vmem:[%s2374_s26 + $0x598] sm:$0xff] }
 0x194   : > { %v1167_v53 = vmul.f32 %v3552_v45, %v402_v56 }
 0x195   : > { %v1669_v9 = vadd.f32 %v1668_v62, %v1160_v51  ;;  %v3559_v51 = vld [vmem:[%s2380_s28 + $0x568] sm:$0xff]  ;;  %v1908_v36 = vadd.f32 %v1907_v32, %v1400_v38  ;;  %v1403_v62 = vmul.f32 %v3419_v57, %v638_v34  ;;  %v641_v57 = vld [vmem:[%s2374_s26 + $0xcd8] sm:$0xff]  ;;  %v410_v34 = vld [vmem:[%s2374_s26 + $0x5a0] sm:$0xff] }
 0x196   : > { %v1168_v61 = vmul.f32 %v3559_v51, %v403_v60 }
 0x197   : > { %v1670_v19 = vadd.f32 %v1669_v9, %v1161_v59  ;;  %v3566_v59 = vld [vmem:[%s2380_s28 + $0x570] sm:$0xff]  ;;  %v1909_v40 = vadd.f32 %v1908_v36, %v1401_v47  ;;  %v1404_v9 = vmul.f32 %v3426_v63, %v639_v43  ;;  %v642_v63 = vld [vmem:[%s2374_s26 + $0xce0] sm:$0xff]  ;;  %v411_v43 = vld [vmem:[%s2374_s26 + $0x5a8] sm:$0xff] }
 0x198   : > { %v1169_v7 = vmul.f32 %v3566_v59, %v404_v0 }
 0x199   : > { %v1671_v29 = vadd.f32 %v1670_v19, %v1162_v5  ;;  %v3573_v5 = vld [vmem:[%s2380_s28 + $0x578] sm:$0xff]  ;;  %v1910_v44 = vadd.f32 %v1909_v40, %v1402_v54  ;;  %v1405_v19 = vmul.f32 %v3433_v10, %v640_v50  ;;  %v643_v10 = vld [vmem:[%s2374_s26 + $0xce8] sm:$0xff]  ;;  %v412_v50 = vld [vmem:[%s2374_s26 + $0x5b0] sm:$0xff] }
 0x19a   : > { %v1170_v18 = vmul.f32 %v3573_v5, %v405_v6 }
 0x19b   : > { %v1672_v39 = vadd.f32 %v1671_v29, %v1163_v15  ;;  %v3580_v15 = vld [vmem:[%s2380_s28 + $0x580] sm:$0xff]  ;;  %v1911_v48 = vadd.f32 %v1910_v44, %v1403_v62  ;;  %v1406_v29 = vmul.f32 %v3440_v21, %v641_v57  ;;  %v644_v21 = vld [vmem:[%s2374_s26 + $0xcf0] sm:$0xff]  ;;  %v413_v57 = vld [vmem:[%s2374_s26 + $0x5b8] sm:$0xff] }
 0x19c   : > { %v1171_v27 = vmul.f32 %v3580_v15, %v406_v11 }
 0x19d   : > { %v1673_v49 = vadd.f32 %v1672_v39, %v1164_v26  ;;  %v3587_v26 = vld [vmem:[%s2380_s28 + $0x588] sm:$0xff]  ;;  %v1912_v52 = vadd.f32 %v1911_v48, %v1404_v9  ;;  %v1407_v39 = vmul.f32 %v3447_v31, %v642_v63  ;;  %v645_v31 = vld [vmem:[%s2374_s26 + $0xcf8] sm:$0xff]  ;;  %v414_v63 = vld [vmem:[%s2374_s26 + $0x5c0] sm:$0xff] }
 0x19e   : > { %v1172_v38 = vmul.f32 %v3587_v26, %v407_v17 }
 0x19f   : > { %v1674_v55 = vadd.f32 %v1673_v49, %v1165_v37  ;;  %v3594_v37 = vld [vmem:[%s2380_s28 + $0x590] sm:$0xff]  ;;  %v1913_v56 = vadd.f32 %v1912_v52, %v1405_v19  ;;  %v1408_v49 = vmul.f32 %v3454_v41, %v643_v10  ;;  %v646_v41 = vld [vmem:[%s2374_s26 + $0xd00] sm:$0xff]  ;;  %v415_v10 = vld [vmem:[%s2374_s26 + $0x5c8] sm:$0xff] }
 0x1a0   : > { %v1173_v47 = vmul.f32 %v3594_v37, %v408_v22 }
 0x1a1   : > { %v1675_v12 = vadd.f32 %v1674_v55, %v1166_v46  ;;  %v3601_v46 = vld [vmem:[%s2380_s28 + $0x598] sm:$0xff]  ;;  %v1914_v60 = vadd.f32 %v1913_v56, %v1406_v29  ;;  %v1409_v55 = vmul.f32 %v3461_v3, %v644_v21  ;;  %v647_v3 = vld [vmem:[%s2374_s26 + $0xd08] sm:$0xff]  ;;  %v416_v21 = vld [vmem:[%s2374_s26 + $0x5d0] sm:$0xff] }
 0x1a2   : > { %v1174_v54 = vmul.f32 %v3601_v46, %v409_v30 }
 0x1a3   : > { %v1676_v16 = vadd.f32 %v1675_v12, %v1167_v53  ;;  %v3608_v53 = vld [vmem:[%s2380_s28 + $0x5a0] sm:$0xff]  ;;  %v1915_v0 = vadd.f32 %v1914_v60, %v1407_v39  ;;  %v1410_v12 = vmul.f32 %v3468_v8, %v645_v31  ;;  %v648_v8 = vld [vmem:[%s2374_s26 + $0xd10] sm:$0xff]  ;;  %v417_v31 = vld [vmem:[%s2374_s26 + $0x5d8] sm:$0xff] }
 0x1a4   : > { %v1175_v62 = vmul.f32 %v3608_v53, %v410_v34 }
 0x1a5   : > { %v1677_v20 = vadd.f32 %v1676_v16, %v1168_v61  ;;  %v3615_v61 = vld [vmem:[%s2380_s28 + $0x5a8] sm:$0xff]  ;;  %v1916_v6 = vadd.f32 %v1915_v0, %v1408_v49  ;;  %v1411_v16 = vmul.f32 %v3475_v1, %v646_v41  ;;  %v649_v1 = vld [vmem:[%s2374_s26 + $0xd18] sm:$0xff]  ;;  %v418_v41 = vld [vmem:[%s2374_s26 + $0x5e0] sm:$0xff] }
 0x1a6   : > { %v1176_v9 = vmul.f32 %v3615_v61, %v411_v43 }
 0x1a7   : > { %v1678_v24 = vadd.f32 %v1677_v20, %v1169_v7  ;;  %v3622_v7 = vld [vmem:[%s2380_s28 + $0x5b0] sm:$0xff]  ;;  %v1917_v11 = vadd.f32 %v1916_v6, %v1409_v55  ;;  %v1412_v20 = vmul.f32 %v3482_v13, %v647_v3  ;;  %v650_v13 = vld [vmem:[%s2374_s26 + $0xd20] sm:$0xff]  ;;  %v419_v3 = vld [vmem:[%s2374_s26 + $0x5e8] sm:$0xff] }
 0x1a8   : > { %v1177_v19 = vmul.f32 %v3622_v7, %v412_v50 }
 0x1a9   : > { %v1679_v28 = vadd.f32 %v1678_v24, %v1170_v18  ;;  %v3629_v18 = vld [vmem:[%s2380_s28 + $0x5b8] sm:$0xff]  ;;  %v1918_v17 = vadd.f32 %v1917_v11, %v1410_v12  ;;  %v1413_v24 = vmul.f32 %v3489_v23, %v648_v8  ;;  %v651_v23 = vld [vmem:[%s2374_s26 + $0xd28] sm:$0xff]  ;;  %v420_v8 = vld [vmem:[%s2374_s26 + $0x5f0] sm:$0xff] }
 0x1aa   : > { %v1178_v29 = vmul.f32 %v3629_v18, %v413_v57 }
 0x1ab   : > { %v1680_v32 = vadd.f32 %v1679_v28, %v1171_v27  ;;  %v3636_v27 = vld [vmem:[%s2380_s28 + $0x5c0] sm:$0xff]  ;;  %v1919_v22 = vadd.f32 %v1918_v17, %v1411_v16  ;;  %v1414_v28 = vmul.f32 %v3496_v33, %v649_v1  ;;  %v652_v33 = vld [vmem:[%s2374_s26 + $0xd30] sm:$0xff]  ;;  %v421_v1 = vld [vmem:[%s2374_s26 + $0x5f8] sm:$0xff] }
 0x1ac   : > { %v1179_v39 = vmul.f32 %v3636_v27, %v414_v63 }
 0x1ad   : > { %v1681_v36 = vadd.f32 %v1680_v32, %v1172_v38  ;;  %v3643_v38 = vld [vmem:[%s2380_s28 + $0x5c8] sm:$0xff]  ;;  %v1920_v30 = vadd.f32 %v1919_v22, %v1412_v20  ;;  %v1415_v32 = vmul.f32 %v3503_v42, %v650_v13  ;;  %v653_v42 = vld [vmem:[%s2374_s26 + $0xd38] sm:$0xff]  ;;  %v422_v13 = vld [vmem:[%s2374_s26 + $0x600] sm:$0xff] }
 0x1ae   : > { %v1180_v49 = vmul.f32 %v3643_v38, %v415_v10 }
 0x1af   : > { %v1682_v40 = vadd.f32 %v1681_v36, %v1173_v47  ;;  %v3650_v47 = vld [vmem:[%s2380_s28 + $0x5d0] sm:$0xff]  ;;  %v1921_v34 = vadd.f32 %v1920_v30, %v1413_v24  ;;  %v1416_v36 = vmul.f32 %v3510_v4, %v651_v23  ;;  %v654_v4 = vld [vmem:[%s2374_s26 + $0xd40] sm:$0xff]  ;;  %v423_v23 = vld [vmem:[%s2374_s26 + $0x608] sm:$0xff] }
 0x1b0   : > { %v1181_v55 = vmul.f32 %v3650_v47, %v416_v21 }
 0x1b1   : > { %v1683_v44 = vadd.f32 %v1682_v40, %v1174_v54  ;;  %v3657_v54 = vld [vmem:[%s2380_s28 + $0x5d8] sm:$0xff]  ;;  %v1922_v43 = vadd.f32 %v1921_v34, %v1414_v28  ;;  %v1417_v40 = vmul.f32 %v3517_v58, %v652_v33  ;;  %v655_v58 = vld [vmem:[%s2374_s26 + $0xd48] sm:$0xff]  ;;  %v424_v33 = vld [vmem:[%s2374_s26 + $0x610] sm:$0xff] }
 0x1b2   : > { %v1182_v12 = vmul.f32 %v3657_v54, %v417_v31 }
 0x1b3   : > { %v1684_v48 = vadd.f32 %v1683_v44, %v1175_v62  ;;  %v3664_v62 = vld [vmem:[%s2380_s28 + $0x5e0] sm:$0xff]  ;;  %v1923_v50 = vadd.f32 %v1922_v43, %v1415_v32  ;;  %v1418_v44 = vmul.f32 %v3524_v2, %v653_v42  ;;  %v656_v2 = vld [vmem:[%s2374_s26 + $0xd50] sm:$0xff]  ;;  %v425_v42 = vld [vmem:[%s2374_s26 + $0x618] sm:$0xff] }
 0x1b4   : > { %v1183_v16 = vmul.f32 %v3664_v62, %v418_v41 }
 0x1b5   : > { %v1685_v52 = vadd.f32 %v1684_v48, %v1176_v9  ;;  %v3671_v9 = vld [vmem:[%s2380_s28 + $0x5e8] sm:$0xff]  ;;  %v1924_v57 = vadd.f32 %v1923_v50, %v1416_v36  ;;  %v1419_v48 = vmul.f32 %v3531_v14, %v654_v4  ;;  %v657_v14 = vld [vmem:[%s2374_s26 + $0xd58] sm:$0xff]  ;;  %v426_v4 = vld [vmem:[%s2374_s26 + $0x620] sm:$0xff] }
 0x1b6   : > { %v1184_v20 = vmul.f32 %v3671_v9, %v419_v3 }
 0x1b7   : > { %v1686_v56 = vadd.f32 %v1685_v52, %v1177_v19  ;;  %v3678_v19 = vld [vmem:[%s2380_s28 + $0x5f0] sm:$0xff]  ;;  %v1925_v63 = vadd.f32 %v1924_v57, %v1417_v40  ;;  %v1420_v52 = vmul.f32 %v3538_v25, %v655_v58  ;;  %v658_v25 = vld [vmem:[%s2374_s26 + $0xd60] sm:$0xff]  ;;  %v427_v58 = vld [vmem:[%s2374_s26 + $0x628] sm:$0xff] }
 0x1b8   : > { %v1185_v24 = vmul.f32 %v3678_v19, %v420_v8 }
 0x1b9   : > { %v1687_v60 = vadd.f32 %v1686_v56, %v1178_v29  ;;  %v3685_v29 = vld [vmem:[%s2380_s28 + $0x5f8] sm:$0xff]  ;;  %v1926_v10 = vadd.f32 %v1925_v63, %v1418_v44  ;;  %v1421_v56 = vmul.f32 %v3545_v35, %v656_v2  ;;  %v659_v35 = vld [vmem:[%s2374_s26 + $0xd68] sm:$0xff]  ;;  %v428_v2 = vld [vmem:[%s2374_s26 + $0x630] sm:$0xff] }
 0x1ba   : > { %v1186_v28 = vmul.f32 %v3685_v29, %v421_v1 }
 0x1bb   : > { %v1688_v0 = vadd.f32 %v1687_v60, %v1179_v39  ;;  %v3692_v39 = vld [vmem:[%s2380_s28 + $0x600] sm:$0xff]  ;;  %v1927_v21 = vadd.f32 %v1926_v10, %v1419_v48  ;;  %v1422_v60 = vmul.f32 %v3552_v45, %v657_v14  ;;  %v660_v45 = vld [vmem:[%s2374_s26 + $0xd70] sm:$0xff]  ;;  %v429_v14 = vld [vmem:[%s2374_s26 + $0x638] sm:$0xff] }
 0x1bc   : > { %v1187_v32 = vmul.f32 %v3692_v39, %v422_v13 }
 0x1bd   : > { %v1689_v6 = vadd.f32 %v1688_v0, %v1180_v49  ;;  %v3699_v49 = vld [vmem:[%s2380_s28 + $0x608] sm:$0xff]  ;;  %v1928_v31 = vadd.f32 %v1927_v21, %v1420_v52  ;;  %v1423_v0 = vmul.f32 %v3559_v51, %v658_v25  ;;  %v661_v51 = vld [vmem:[%s2374_s26 + $0xd78] sm:$0xff]  ;;  %v430_v25 = vld [vmem:[%s2374_s26 + $0x640] sm:$0xff] }
 0x1be   : > { %v1188_v36 = vmul.f32 %v3699_v49, %v423_v23 }
 0x1bf   : > { %v1690_v11 = vadd.f32 %v1689_v6, %v1181_v55  ;;  %v3706_v55 = vld [vmem:[%s2380_s28 + $0x610] sm:$0xff]  ;;  %v1929_v41 = vadd.f32 %v1928_v31, %v1421_v56  ;;  %v1424_v6 = vmul.f32 %v3566_v59, %v659_v35  ;;  %v662_v59 = vld [vmem:[%s2374_s26 + $0xd80] sm:$0xff]  ;;  %v431_v35 = vld [vmem:[%s2374_s26 + $0x648] sm:$0xff] }
 0x1c0   : > { %v1189_v40 = vmul.f32 %v3706_v55, %v424_v33 }
 0x1c1   : > { %v1691_v17 = vadd.f32 %v1690_v11, %v1182_v12  ;;  %v3713_v12 = vld [vmem:[%s2380_s28 + $0x618] sm:$0xff]  ;;  %v1930_v3 = vadd.f32 %v1929_v41, %v1422_v60  ;;  %v1425_v11 = vmul.f32 %v3573_v5, %v660_v45  ;;  %v663_v5 = vld [vmem:[%s2374_s26 + $0xd88] sm:$0xff]  ;;  %v432_v45 = vld [vmem:[%s2374_s26 + $0x650] sm:$0xff] }
 0x1c2   : > { %v1190_v44 = vmul.f32 %v3713_v12, %v425_v42 }
 0x1c3   : > { %v1692_v22 = vadd.f32 %v1691_v17, %v1183_v16  ;;  %v3720_v16 = vld [vmem:[%s2380_s28 + $0x620] sm:$0xff]  ;;  %v1931_v8 = vadd.f32 %v1930_v3, %v1423_v0  ;;  %v1426_v17 = vmul.f32 %v3580_v15, %v661_v51  ;;  %v664_v15 = vld [vmem:[%s2374_s26 + $0xd90] sm:$0xff]  ;;  %v433_v51 = vld [vmem:[%s2374_s26 + $0x658] sm:$0xff] }
 0x1c4   : > { %v1191_v48 = vmul.f32 %v3720_v16, %v426_v4 }
 0x1c5   : > { %v1693_v30 = vadd.f32 %v1692_v22, %v1184_v20  ;;  %v3727_v20 = vld [vmem:[%s2380_s28 + $0x628] sm:$0xff]  ;;  %v1932_v1 = vadd.f32 %v1931_v8, %v1424_v6  ;;  %v1427_v22 = vmul.f32 %v3587_v26, %v662_v59  ;;  %v665_v26 = vld [vmem:[%s2374_s26 + $0xd98] sm:$0xff]  ;;  %v434_v59 = vld [vmem:[%s2374_s26 + $0x660] sm:$0xff] }
 0x1c6   : > { %v1192_v52 = vmul.f32 %v3727_v20, %v427_v58 }
 0x1c7   : > { %v1694_v34 = vadd.f32 %v1693_v30, %v1185_v24  ;;  %v3734_v24 = vld [vmem:[%s2380_s28 + $0x630] sm:$0xff]  ;;  %v1933_v13 = vadd.f32 %v1932_v1, %v1425_v11  ;;  %v1428_v30 = vmul.f32 %v3594_v37, %v663_v5  ;;  %v666_v37 = vld [vmem:[%s2374_s26 + $0xda0] sm:$0xff]  ;;  %v435_v5 = vld [vmem:[%s2374_s26 + $0x668] sm:$0xff] }
 0x1c8   : > { %v1193_v56 = vmul.f32 %v3734_v24, %v428_v2 }
 0x1c9   : > { %v1695_v43 = vadd.f32 %v1694_v34, %v1186_v28  ;;  %v3741_v28 = vld [vmem:[%s2380_s28 + $0x638] sm:$0xff]  ;;  %v1934_v23 = vadd.f32 %v1933_v13, %v1426_v17  ;;  %v1429_v34 = vmul.f32 %v3601_v46, %v664_v15  ;;  %v667_v46 = vld [vmem:[%s2374_s26 + $0xda8] sm:$0xff]  ;;  %v436_v15 = vld [vmem:[%s2374_s26 + $0x670] sm:$0xff] }
 0x1ca   : > { %v1194_v60 = vmul.f32 %v3741_v28, %v429_v14 }
 0x1cb   : > { %v1696_v50 = vadd.f32 %v1695_v43, %v1187_v32  ;;  %v3748_v32 = vld [vmem:[%s2380_s28 + $0x640] sm:$0xff]  ;;  %v1935_v33 = vadd.f32 %v1934_v23, %v1427_v22  ;;  %v1430_v43 = vmul.f32 %v3608_v53, %v665_v26  ;;  %v668_v53 = vld [vmem:[%s2374_s26 + $0xdb0] sm:$0xff]  ;;  %v437_v26 = vld [vmem:[%s2374_s26 + $0x678] sm:$0xff] }
 0x1cc   : > { %v1195_v0 = vmul.f32 %v3748_v32, %v430_v25 }
 0x1cd   : > { %v1697_v57 = vadd.f32 %v1696_v50, %v1188_v36  ;;  %v3755_v36 = vld [vmem:[%s2380_s28 + $0x648] sm:$0xff]  ;;  %v1936_v42 = vadd.f32 %v1935_v33, %v1428_v30  ;;  %v1431_v50 = vmul.f32 %v3615_v61, %v666_v37  ;;  %v669_v61 = vld [vmem:[%s2374_s26 + $0xdb8] sm:$0xff]  ;;  %v438_v37 = vld [vmem:[%s2374_s26 + $0x680] sm:$0xff] }
 0x1ce   : > { %v1196_v6 = vmul.f32 %v3755_v36, %v431_v35 }
 0x1cf   : > { %v1698_v63 = vadd.f32 %v1697_v57, %v1189_v40  ;;  %v3762_v40 = vld [vmem:[%s2380_s28 + $0x650] sm:$0xff]  ;;  %v1937_v4 = vadd.f32 %v1936_v42, %v1429_v34  ;;  %v1432_v57 = vmul.f32 %v3622_v7, %v667_v46  ;;  %v670_v7 = vld [vmem:[%s2374_s26 + $0xdc0] sm:$0xff]  ;;  %v439_v46 = vld [vmem:[%s2374_s26 + $0x688] sm:$0xff] }
 0x1d0   : > { %v1197_v11 = vmul.f32 %v3762_v40, %v432_v45 }
 0x1d1   : > { %v1699_v10 = vadd.f32 %v1698_v63, %v1190_v44  ;;  %v3769_v44 = vld [vmem:[%s2380_s28 + $0x658] sm:$0xff]  ;;  %v1938_v58 = vadd.f32 %v1937_v4, %v1430_v43  ;;  %v1433_v63 = vmul.f32 %v3629_v18, %v668_v53  ;;  %v671_v18 = vld [vmem:[%s2374_s26 + $0xdc8] sm:$0xff]  ;;  %v440_v53 = vld [vmem:[%s2374_s26 + $0x690] sm:$0xff] }
 0x1d2   : > { %v1198_v17 = vmul.f32 %v3769_v44, %v433_v51 }
 0x1d3   : > { %v1700_v21 = vadd.f32 %v1699_v10, %v1191_v48  ;;  %v3776_v48 = vld [vmem:[%s2380_s28 + $0x660] sm:$0xff]  ;;  %v1939_v2 = vadd.f32 %v1938_v58, %v1431_v50  ;;  %v1434_v10 = vmul.f32 %v3636_v27, %v669_v61  ;;  %v672_v27 = vld [vmem:[%s2374_s26 + $0xdd0] sm:$0xff]  ;;  %v441_v61 = vld [vmem:[%s2374_s26 + $0x698] sm:$0xff] }
 0x1d4   : > { %v1199_v22 = vmul.f32 %v3776_v48, %v434_v59 }
 0x1d5   : > { %v1701_v31 = vadd.f32 %v1700_v21, %v1192_v52  ;;  %v3783_v52 = vld [vmem:[%s2380_s28 + $0x668] sm:$0xff]  ;;  %v1940_v14 = vadd.f32 %v1939_v2, %v1432_v57  ;;  %v1435_v21 = vmul.f32 %v3643_v38, %v670_v7  ;;  %v673_v38 = vld [vmem:[%s2374_s26 + $0xdd8] sm:$0xff]  ;;  %v442_v7 = vld [vmem:[%s2374_s26 + $0x6a0] sm:$0xff] }
 0x1d6   : > { %v1200_v30 = vmul.f32 %v3783_v52, %v435_v5 }
 0x1d7   : > { %v1702_v41 = vadd.f32 %v1701_v31, %v1193_v56  ;;  %v3790_v56 = vld [vmem:[%s2380_s28 + $0x670] sm:$0xff]  ;;  %v1941_v25 = vadd.f32 %v1940_v14, %v1433_v63  ;;  %v1436_v31 = vmul.f32 %v3650_v47, %v671_v18  ;;  %v674_v47 = vld [vmem:[%s2374_s26 + $0xde0] sm:$0xff]  ;;  %v443_v18 = vld [vmem:[%s2374_s26 + $0x6a8] sm:$0xff] }
 0x1d8   : > { %v1201_v34 = vmul.f32 %v3790_v56, %v436_v15 }
 0x1d9   : > { %v1703_v3 = vadd.f32 %v1702_v41, %v1194_v60  ;;  %v3797_v60 = vld [vmem:[%s2380_s28 + $0x678] sm:$0xff]  ;;  %v1942_v35 = vadd.f32 %v1941_v25, %v1434_v10  ;;  %v1437_v41 = vmul.f32 %v3657_v54, %v672_v27  ;;  %v675_v54 = vld [vmem:[%s2374_s26 + $0xde8] sm:$0xff]  ;;  %v444_v27 = vld [vmem:[%s2374_s26 + $0x6b0] sm:$0xff] }
 0x1da   : > { %v1202_v43 = vmul.f32 %v3797_v60, %v437_v26 }
 0x1db   : > { %v1704_v8 = vadd.f32 %v1703_v3, %v1195_v0  ;;  %v3804_v0 = vld [vmem:[%s2380_s28 + $0x680] sm:$0xff]  ;;  %v1943_v45 = vadd.f32 %v1942_v35, %v1435_v21  ;;  %v1438_v3 = vmul.f32 %v3664_v62, %v673_v38  ;;  %v676_v62 = vld [vmem:[%s2374_s26 + $0xdf0] sm:$0xff]  ;;  %v445_v38 = vld [vmem:[%s2374_s26 + $0x6b8] sm:$0xff] }
 0x1dc   : > { %v1203_v50 = vmul.f32 %v3804_v0, %v438_v37 }
 0x1dd   : > { %v1705_v1 = vadd.f32 %v1704_v8, %v1196_v6  ;;  %v3811_v6 = vld [vmem:[%s2380_s28 + $0x688] sm:$0xff]  ;;  %v1944_v51 = vadd.f32 %v1943_v45, %v1436_v31  ;;  %v1439_v8 = vmul.f32 %v3671_v9, %v674_v47  ;;  %v677_v9 = vld [vmem:[%s2374_s26 + $0xdf8] sm:$0xff]  ;;  %v446_v47 = vld [vmem:[%s2374_s26 + $0x6c0] sm:$0xff] }
 0x1de   : > { %v1204_v57 = vmul.f32 %v3811_v6, %v439_v46 }
 0x1df   : > { %v1706_v13 = vadd.f32 %v1705_v1, %v1197_v11  ;;  %v3818_v11 = vld [vmem:[%s2380_s28 + $0x690] sm:$0xff]  ;;  %v1945_v59 = vadd.f32 %v1944_v51, %v1437_v41  ;;  %v1440_v1 = vmul.f32 %v3678_v19, %v675_v54  ;;  %v678_v19 = vld [vmem:[%s2374_s26 + $0xe00] sm:$0xff]  ;;  %v447_v54 = vld [vmem:[%s2374_s26 + $0x6c8] sm:$0xff] }
 0x1e0   : > { %v1205_v63 = vmul.f32 %v3818_v11, %v440_v53 }
 0x1e1   : > { %v1707_v23 = vadd.f32 %v1706_v13, %v1198_v17  ;;  %v3825_v17 = vld [vmem:[%s2380_s28 + $0x698] sm:$0xff]  ;;  %v1946_v5 = vadd.f32 %v1945_v59, %v1438_v3  ;;  %v1441_v13 = vmul.f32 %v3685_v29, %v676_v62  ;;  %v679_v29 = vld [vmem:[%s2374_s26 + $0xe08] sm:$0xff]  ;;  %v448_v62 = vld [vmem:[%s2374_s26 + $0x6d0] sm:$0xff] }
 0x1e2   : > { %v1206_v10 = vmul.f32 %v3825_v17, %v441_v61 }
 0x1e3   : > { %v1708_v33 = vadd.f32 %v1707_v23, %v1199_v22  ;;  %v3832_v22 = vld [vmem:[%s2380_s28 + $0x6a0] sm:$0xff]  ;;  %v1947_v15 = vadd.f32 %v1946_v5, %v1439_v8  ;;  %v1442_v23 = vmul.f32 %v3692_v39, %v677_v9  ;;  %v680_v39 = vld [vmem:[%s2374_s26 + $0xe10] sm:$0xff]  ;;  %v449_v9 = vld [vmem:[%s2374_s26 + $0x6d8] sm:$0xff] }
 0x1e4   : > { %v1207_v21 = vmul.f32 %v3832_v22, %v442_v7 }
 0x1e5   : > { %v1709_v42 = vadd.f32 %v1708_v33, %v1200_v30  ;;  %v3839_v30 = vld [vmem:[%s2380_s28 + $0x6a8] sm:$0xff]  ;;  %v1948_v26 = vadd.f32 %v1947_v15, %v1440_v1  ;;  %v1443_v33 = vmul.f32 %v3699_v49, %v678_v19  ;;  %v681_v49 = vld [vmem:[%s2374_s26 + $0xe18] sm:$0xff]  ;;  %v450_v19 = vld [vmem:[%s2374_s26 + $0x6e0] sm:$0xff] }
 0x1e6   : > { %v1208_v31 = vmul.f32 %v3839_v30, %v443_v18 }
 0x1e7   : > { %v1710_v4 = vadd.f32 %v1709_v42, %v1201_v34  ;;  %v3846_v34 = vld [vmem:[%s2380_s28 + $0x6b0] sm:$0xff]  ;;  %v1949_v37 = vadd.f32 %v1948_v26, %v1441_v13  ;;  %v1444_v42 = vmul.f32 %v3706_v55, %v679_v29  ;;  %v682_v55 = vld [vmem:[%s2374_s26 + $0xe20] sm:$0xff]  ;;  %v451_v29 = vld [vmem:[%s2374_s26 + $0x6e8] sm:$0xff] }
 0x1e8   : > { %v1209_v41 = vmul.f32 %v3846_v34, %v444_v27 }
 0x1e9   : > { %v1711_v58 = vadd.f32 %v1710_v4, %v1202_v43  ;;  %v3853_v43 = vld [vmem:[%s2380_s28 + $0x6b8] sm:$0xff]  ;;  %v1950_v46 = vadd.f32 %v1949_v37, %v1442_v23  ;;  %v1445_v4 = vmul.f32 %v3713_v12, %v680_v39  ;;  %v683_v12 = vld [vmem:[%s2374_s26 + $0xe28] sm:$0xff]  ;;  %v452_v39 = vld [vmem:[%s2374_s26 + $0x6f0] sm:$0xff] }
 0x1ea   : > { %v1210_v3 = vmul.f32 %v3853_v43, %v445_v38 }
 0x1eb   : > { %v1712_v2 = vadd.f32 %v1711_v58, %v1203_v50  ;;  %v3860_v50 = vld [vmem:[%s2380_s28 + $0x6c0] sm:$0xff]  ;;  %v1951_v53 = vadd.f32 %v1950_v46, %v1443_v33  ;;  %v1446_v58 = vmul.f32 %v3720_v16, %v681_v49  ;;  %v684_v16 = vld [vmem:[%s2374_s26 + $0xe30] sm:$0xff]  ;;  %v453_v49 = vld [vmem:[%s2374_s26 + $0x6f8] sm:$0xff] }
 0x1ec   : > { %v1211_v8 = vmul.f32 %v3860_v50, %v446_v47 }
 0x1ed   : > { %v1713_v14 = vadd.f32 %v1712_v2, %v1204_v57  ;;  %v3867_v57 = vld [vmem:[%s2380_s28 + $0x6c8] sm:$0xff]  ;;  %v1952_v61 = vadd.f32 %v1951_v53, %v1444_v42  ;;  %v1447_v2 = vmul.f32 %v3727_v20, %v682_v55  ;;  %v685_v20 = vld [vmem:[%s2374_s26 + $0xe38] sm:$0xff]  ;;  %v454_v55 = vld [vmem:[%s2374_s26 + $0x700] sm:$0xff] }
 0x1ee   : > { %v1212_v1 = vmul.f32 %v3867_v57, %v447_v54 }
 0x1ef   : > { %v1714_v25 = vadd.f32 %v1713_v14, %v1205_v63  ;;  %v3874_v63 = vld [vmem:[%s2380_s28 + $0x6d0] sm:$0xff]  ;;  %v1953_v7 = vadd.f32 %v1952_v61, %v1445_v4  ;;  %v1448_v14 = vmul.f32 %v3734_v24, %v683_v12  ;;  %v686_v24 = vld [vmem:[%s2374_s26 + $0xe40] sm:$0xff]  ;;  %v455_v12 = vld [vmem:[%s2374_s26 + $0x708] sm:$0xff] }
 0x1f0   : > { %v1213_v13 = vmul.f32 %v3874_v63, %v448_v62 }
 0x1f1   : > { %v1715_v35 = vadd.f32 %v1714_v25, %v1206_v10  ;;  %v3881_v10 = vld [vmem:[%s2380_s28 + $0x6d8] sm:$0xff]  ;;  %v1954_v18 = vadd.f32 %v1953_v7, %v1446_v58  ;;  %v1449_v25 = vmul.f32 %v3741_v28, %v684_v16  ;;  %v687_v28 = vld [vmem:[%s2374_s26 + $0xe48] sm:$0xff]  ;;  %v456_v16 = vld [vmem:[%s2374_s26 + $0x710] sm:$0xff] }
 0x1f2   : > { %v1214_v23 = vmul.f32 %v3881_v10, %v449_v9 }
 0x1f3   : > { %v1716_v45 = vadd.f32 %v1715_v35, %v1207_v21  ;;  %v3888_v21 = vld [vmem:[%s2380_s28 + $0x6e0] sm:$0xff]  ;;  %v1955_v27 = vadd.f32 %v1954_v18, %v1447_v2  ;;  %v1450_v35 = vmul.f32 %v3748_v32, %v685_v20  ;;  %v688_v32 = vld [vmem:[%s2374_s26 + $0xe50] sm:$0xff]  ;;  %v457_v20 = vld [vmem:[%s2374_s26 + $0x718] sm:$0xff] }
 0x1f4   : > { %v1215_v33 = vmul.f32 %v3888_v21, %v450_v19 }
 0x1f5   : > { %v1717_v51 = vadd.f32 %v1716_v45, %v1208_v31  ;;  %v3895_v31 = vld [vmem:[%s2380_s28 + $0x6e8] sm:$0xff]  ;;  %v1956_v38 = vadd.f32 %v1955_v27, %v1448_v14  ;;  %v1451_v45 = vmul.f32 %v3755_v36, %v686_v24  ;;  %v689_v36 = vld [vmem:[%s2374_s26 + $0xe58] sm:$0xff]  ;;  %v458_v24 = vld [vmem:[%s2374_s26 + $0x720] sm:$0xff] }
 0x1f6   : > { %v1216_v42 = vmul.f32 %v3895_v31, %v451_v29 }
 0x1f7   : > { %v1718_v59 = vadd.f32 %v1717_v51, %v1209_v41  ;;  %v3902_v41 = vld [vmem:[%s2380_s28 + $0x6f0] sm:$0xff]  ;;  %v1957_v47 = vadd.f32 %v1956_v38, %v1449_v25  ;;  %v1452_v51 = vmul.f32 %v3762_v40, %v687_v28  ;;  %v690_v40 = vld [vmem:[%s2374_s26 + $0xe60] sm:$0xff]  ;;  %v459_v28 = vld [vmem:[%s2374_s26 + $0x728] sm:$0xff] }
 0x1f8   : > { %v1217_v4 = vmul.f32 %v3902_v41, %v452_v39 }
 0x1f9   : > { %v1719_v5 = vadd.f32 %v1718_v59, %v1210_v3  ;;  %v3909_v3 = vld [vmem:[%s2380_s28 + $0x6f8] sm:$0xff]  ;;  %v1958_v54 = vadd.f32 %v1957_v47, %v1450_v35  ;;  %v1453_v59 = vmul.f32 %v3769_v44, %v688_v32  ;;  %v691_v44 = vld [vmem:[%s2374_s26 + $0xe68] sm:$0xff]  ;;  %v460_v32 = vld [vmem:[%s2374_s26 + $0x730] sm:$0xff] }
 0x1fa   : > { %v1218_v58 = vmul.f32 %v3909_v3, %v453_v49 }
 0x1fb   : > { %v1720_v15 = vadd.f32 %v1719_v5, %v1211_v8  ;;  %v3916_v8 = vld [vmem:[%s2380_s28 + $0x700] sm:$0xff]  ;;  %v1959_v62 = vadd.f32 %v1958_v54, %v1451_v45  ;;  %v1454_v5 = vmul.f32 %v3776_v48, %v689_v36  ;;  %v692_v48 = vld [vmem:[%s2374_s26 + $0xe70] sm:$0xff]  ;;  %v461_v36 = vld [vmem:[%s2374_s26 + $0x738] sm:$0xff] }
 0x1fc   : > { %v1219_v2 = vmul.f32 %v3916_v8, %v454_v55 }
 0x1fd   : > { %v1721_v26 = vadd.f32 %v1720_v15, %v1212_v1  ;;  %v3923_v1 = vld [vmem:[%s2380_s28 + $0x708] sm:$0xff]  ;;  %v1960_v9 = vadd.f32 %v1959_v62, %v1452_v51  ;;  %v1455_v15 = vmul.f32 %v3783_v52, %v690_v40  ;;  %v693_v52 = vld [vmem:[%s2374_s26 + $0xe78] sm:$0xff]  ;;  %v462_v40 = vld [vmem:[%s2374_s26 + $0x740] sm:$0xff] }
 0x1fe   : > { %v1220_v14 = vmul.f32 %v3923_v1, %v455_v12 }
 0x1ff   : > { %v1722_v37 = vadd.f32 %v1721_v26, %v1213_v13  ;;  %v3930_v13 = vld [vmem:[%s2380_s28 + $0x710] sm:$0xff]  ;;  %v1961_v19 = vadd.f32 %v1960_v9, %v1453_v59  ;;  %v1456_v26 = vmul.f32 %v3790_v56, %v691_v44  ;;  %v694_v56 = vld [vmem:[%s2374_s26 + $0xe80] sm:$0xff]  ;;  %v463_v44 = vld [vmem:[%s2374_s26 + $0x748] sm:$0xff] }
 0x200   : > { %v1221_v25 = vmul.f32 %v3930_v13, %v456_v16 }
 0x201   : > { %v1723_v46 = vadd.f32 %v1722_v37, %v1214_v23  ;;  %v3937_v23 = vld [vmem:[%s2380_s28 + $0x718] sm:$0xff]  ;;  %v1962_v29 = vadd.f32 %v1961_v19, %v1454_v5  ;;  %v1457_v37 = vmul.f32 %v3797_v60, %v692_v48  ;;  %v695_v60 = vld [vmem:[%s2374_s26 + $0xe88] sm:$0xff]  ;;  %v464_v48 = vld [vmem:[%s2374_s26 + $0x750] sm:$0xff] }
 0x202   : > { %v1222_v35 = vmul.f32 %v3937_v23, %v457_v20 }
 0x203   : > { %v1724_v53 = vadd.f32 %v1723_v46, %v1215_v33  ;;  %v3944_v33 = vld [vmem:[%s2380_s28 + $0x720] sm:$0xff]  ;;  %v1963_v39 = vadd.f32 %v1962_v29, %v1455_v15  ;;  %v1458_v46 = vmul.f32 %v3804_v0, %v693_v52  ;;  %v696_v0 = vld [vmem:[%s2374_s26 + $0xe90] sm:$0xff]  ;;  %v465_v52 = vld [vmem:[%s2374_s26 + $0x758] sm:$0xff] }
 0x204   : > { %v1223_v45 = vmul.f32 %v3944_v33, %v458_v24 }
 0x205   : > { %v1725_v61 = vadd.f32 %v1724_v53, %v1216_v42  ;;  %v3951_v42 = vld [vmem:[%s2380_s28 + $0x728] sm:$0xff]  ;;  %v1964_v49 = vadd.f32 %v1963_v39, %v1456_v26  ;;  %v1459_v53 = vmul.f32 %v3811_v6, %v694_v56  ;;  %v697_v6 = vld [vmem:[%s2374_s26 + $0xe98] sm:$0xff]  ;;  %v466_v56 = vld [vmem:[%s2374_s26 + $0x760] sm:$0xff] }
 0x206   : > { %v1224_v51 = vmul.f32 %v3951_v42, %v459_v28 }
 0x207   : > { %v1726_v7 = vadd.f32 %v1725_v61, %v1217_v4  ;;  %v3958_v4 = vld [vmem:[%s2380_s28 + $0x730] sm:$0xff]  ;;  %v1965_v55 = vadd.f32 %v1964_v49, %v1457_v37  ;;  %v1460_v61 = vmul.f32 %v3818_v11, %v695_v60  ;;  %v698_v11 = vld [vmem:[%s2374_s26 + $0xea0] sm:$0xff]  ;;  %v467_v60 = vld [vmem:[%s2374_s26 + $0x768] sm:$0xff] }
 0x208   : > { %v1225_v59 = vmul.f32 %v3958_v4, %v460_v32 }
 0x209   : > { %v1727_v18 = vadd.f32 %v1726_v7, %v1218_v58  ;;  %v3965_v58 = vld [vmem:[%s2380_s28 + $0x738] sm:$0xff]  ;;  %v1966_v12 = vadd.f32 %v1965_v55, %v1458_v46  ;;  %v1461_v7 = vmul.f32 %v3825_v17, %v696_v0  ;;  %v699_v17 = vld [vmem:[%s2374_s26 + $0xea8] sm:$0xff]  ;;  %v468_v0 = vld [vmem:[%s2374_s26 + $0x770] sm:$0xff] }
 0x20a   : > { %v1226_v5 = vmul.f32 %v3965_v58, %v461_v36 }
 0x20b   : > { %v1728_v27 = vadd.f32 %v1727_v18, %v1219_v2  ;;  %v3972_v2 = vld [vmem:[%s2380_s28 + $0x740] sm:$0xff]  ;;  %v1967_v16 = vadd.f32 %v1966_v12, %v1459_v53  ;;  %v1462_v18 = vmul.f32 %v3832_v22, %v697_v6  ;;  %v700_v22 = vld [vmem:[%s2374_s26 + $0xeb0] sm:$0xff]  ;;  %v469_v6 = vld [vmem:[%s2374_s26 + $0x778] sm:$0xff] }
 0x20c   : > { %v1227_v15 = vmul.f32 %v3972_v2, %v462_v40 }
 0x20d   : > { %v1729_v38 = vadd.f32 %v1728_v27, %v1220_v14  ;;  %v3979_v14 = vld [vmem:[%s2380_s28 + $0x748] sm:$0xff]  ;;  %v1968_v20 = vadd.f32 %v1967_v16, %v1460_v61  ;;  %v1463_v27 = vmul.f32 %v3839_v30, %v698_v11  ;;  %v701_v30 = vld [vmem:[%s2374_s26 + $0xeb8] sm:$0xff]  ;;  %v470_v11 = vld [vmem:[%s2374_s26 + $0x780] sm:$0xff] }
 0x20e   : > { %v1228_v26 = vmul.f32 %v3979_v14, %v463_v44 }
 0x20f   : > { %v1730_v47 = vadd.f32 %v1729_v38, %v1221_v25  ;;  %v3986_v25 = vld [vmem:[%s2380_s28 + $0x750] sm:$0xff]  ;;  %v1969_v24 = vadd.f32 %v1968_v20, %v1461_v7  ;;  %v1464_v38 = vmul.f32 %v3846_v34, %v699_v17  ;;  %v702_v34 = vld [vmem:[%s2374_s26 + $0xec0] sm:$0xff]  ;;  %v471_v17 = vld [vmem:[%s2374_s26 + $0x788] sm:$0xff] }
 0x210   : > { %v1229_v37 = vmul.f32 %v3986_v25, %v464_v48 }
 0x211   : > { %v1731_v54 = vadd.f32 %v1730_v47, %v1222_v35  ;;  %v3993_v35 = vld [vmem:[%s2380_s28 + $0x758] sm:$0xff]  ;;  %v1970_v28 = vadd.f32 %v1969_v24, %v1462_v18  ;;  %v1465_v47 = vmul.f32 %v3853_v43, %v700_v22  ;;  %v703_v43 = vld [vmem:[%s2374_s26 + $0xec8] sm:$0xff]  ;;  %v472_v22 = vld [vmem:[%s2374_s26 + $0x790] sm:$0xff] }
 0x212   : > { %v1230_v46 = vmul.f32 %v3993_v35, %v465_v52 }
 0x213   : > { %v1732_v62 = vadd.f32 %v1731_v54, %v1223_v45  ;;  %v4000_v45 = vld [vmem:[%s2380_s28 + $0x760] sm:$0xff]  ;;  %v1971_v32 = vadd.f32 %v1970_v28, %v1463_v27  ;;  %v1466_v54 = vmul.f32 %v3860_v50, %v701_v30  ;;  %v704_v50 = vld [vmem:[%s2374_s26 + $0xed0] sm:$0xff]  ;;  %v473_v30 = vld [vmem:[%s2374_s26 + $0x798] sm:$0xff] }
 0x214   : > { %v1231_v53 = vmul.f32 %v4000_v45, %v466_v56 }
 0x215   : > { %v1733_v9 = vadd.f32 %v1732_v62, %v1224_v51  ;;  %v4007_v51 = vld [vmem:[%s2380_s28 + $0x768] sm:$0xff]  ;;  %v1972_v36 = vadd.f32 %v1971_v32, %v1464_v38  ;;  %v1467_v62 = vmul.f32 %v3867_v57, %v702_v34  ;;  %v705_v57 = vld [vmem:[%s2374_s26 + $0xed8] sm:$0xff]  ;;  %v474_v34 = vld [vmem:[%s2374_s26 + $0x7a0] sm:$0xff] }
 0x216   : > { %v1232_v61 = vmul.f32 %v4007_v51, %v467_v60 }
 0x217   : > { %v1734_v19 = vadd.f32 %v1733_v9, %v1225_v59  ;;  %v4014_v59 = vld [vmem:[%s2380_s28 + $0x770] sm:$0xff]  ;;  %v1973_v40 = vadd.f32 %v1972_v36, %v1465_v47  ;;  %v1468_v9 = vmul.f32 %v3874_v63, %v703_v43  ;;  %v706_v63 = vld [vmem:[%s2374_s26 + $0xee0] sm:$0xff]  ;;  %v475_v43 = vld [vmem:[%s2374_s26 + $0x7a8] sm:$0xff] }
 0x218   : > { %v1233_v7 = vmul.f32 %v4014_v59, %v468_v0 }
 0x219   : > { %v1735_v29 = vadd.f32 %v1734_v19, %v1226_v5  ;;  %v4021_v5 = vld [vmem:[%s2380_s28 + $0x778] sm:$0xff]  ;;  %v1974_v44 = vadd.f32 %v1973_v40, %v1466_v54  ;;  %v1469_v19 = vmul.f32 %v3881_v10, %v704_v50  ;;  %v707_v10 = vld [vmem:[%s2374_s26 + $0xee8] sm:$0xff]  ;;  %v476_v50 = vld [vmem:[%s2374_s26 + $0x7b0] sm:$0xff] }
 0x21a   : > { %v1234_v18 = vmul.f32 %v4021_v5, %v469_v6 }
 0x21b   : > { %v1736_v39 = vadd.f32 %v1735_v29, %v1227_v15  ;;  %v4028_v15 = vld [vmem:[%s2380_s28 + $0x780] sm:$0xff]  ;;  %v1975_v48 = vadd.f32 %v1974_v44, %v1467_v62  ;;  %v1470_v29 = vmul.f32 %v3888_v21, %v705_v57  ;;  %v708_v21 = vld [vmem:[%s2374_s26 + $0xef0] sm:$0xff]  ;;  %v477_v57 = vld [vmem:[%s2374_s26 + $0x7b8] sm:$0xff] }
 0x21c   : > { %v1235_v27 = vmul.f32 %v4028_v15, %v470_v11 }
 0x21d   : > { %v1737_v49 = vadd.f32 %v1736_v39, %v1228_v26  ;;  %v4035_v26 = vld [vmem:[%s2380_s28 + $0x788] sm:$0xff]  ;;  %v1976_v52 = vadd.f32 %v1975_v48, %v1468_v9  ;;  %v1471_v39 = vmul.f32 %v3895_v31, %v706_v63  ;;  %v709_v31 = vld [vmem:[%s2374_s26 + $0xef8] sm:$0xff]  ;;  %v478_v63 = vld [vmem:[%s2374_s26 + $0x7c0] sm:$0xff] }
 0x21e   : > { %v1236_v38 = vmul.f32 %v4035_v26, %v471_v17 }
 0x21f   : > { %v1738_v55 = vadd.f32 %v1737_v49, %v1229_v37  ;;  %v4042_v37 = vld [vmem:[%s2380_s28 + $0x790] sm:$0xff]  ;;  %v1977_v56 = vadd.f32 %v1976_v52, %v1469_v19  ;;  %v1472_v49 = vmul.f32 %v3902_v41, %v707_v10  ;;  %v710_v41 = vld [vmem:[%s2374_s26 + $0xf00] sm:$0xff]  ;;  %v479_v10 = vld [vmem:[%s2374_s26 + $0x7c8] sm:$0xff] }
 0x220   : > { %v1237_v47 = vmul.f32 %v4042_v37, %v472_v22 }
 0x221   : > { %v1739_v12 = vadd.f32 %v1738_v55, %v1230_v46  ;;  %v4049_v46 = vld [vmem:[%s2380_s28 + $0x798] sm:$0xff]  ;;  %v1978_v60 = vadd.f32 %v1977_v56, %v1470_v29  ;;  %v1473_v55 = vmul.f32 %v3909_v3, %v708_v21  ;;  %v711_v3 = vld [vmem:[%s2374_s26 + $0xf08] sm:$0xff]  ;;  %v480_v21 = vld [vmem:[%s2374_s26 + $0x7d0] sm:$0xff] }
 0x222   : > { %v1238_v54 = vmul.f32 %v4049_v46, %v473_v30 }
 0x223   : > { %v1740_v16 = vadd.f32 %v1739_v12, %v1231_v53  ;;  %v4056_v53 = vld [vmem:[%s2380_s28 + $0x7a0] sm:$0xff]  ;;  %v1979_v0 = vadd.f32 %v1978_v60, %v1471_v39  ;;  %v1474_v12 = vmul.f32 %v3916_v8, %v709_v31  ;;  %v712_v8 = vld [vmem:[%s2374_s26 + $0xf10] sm:$0xff]  ;;  %v481_v31 = vld [vmem:[%s2374_s26 + $0x7d8] sm:$0xff] }
 0x224   : > { %v1239_v62 = vmul.f32 %v4056_v53, %v474_v34 }
 0x225   : > { %v1741_v20 = vadd.f32 %v1740_v16, %v1232_v61  ;;  %v4063_v61 = vld [vmem:[%s2380_s28 + $0x7a8] sm:$0xff]  ;;  %v1980_v6 = vadd.f32 %v1979_v0, %v1472_v49  ;;  %v1475_v16 = vmul.f32 %v3923_v1, %v710_v41  ;;  %v713_v1 = vld [vmem:[%s2374_s26 + $0xf18] sm:$0xff]  ;;  %v482_v41 = vld [vmem:[%s2374_s26 + $0x7e0] sm:$0xff] }
 0x226   : > { %v1240_v9 = vmul.f32 %v4063_v61, %v475_v43 }
 0x227   : > { %v1742_v24 = vadd.f32 %v1741_v20, %v1233_v7  ;;  %v4070_v7 = vld [vmem:[%s2380_s28 + $0x7b0] sm:$0xff]  ;;  %v1981_v11 = vadd.f32 %v1980_v6, %v1473_v55  ;;  %v1476_v20 = vmul.f32 %v3930_v13, %v711_v3  ;;  %v714_v13 = vld [vmem:[%s2374_s26 + $0xf20] sm:$0xff] }
 0x228   : > { %v1241_v19 = vmul.f32 %v4070_v7, %v476_v50  ;;  %v4105_v55 = vld [vmem:[%s2380_s28 + $0x7d8] sm:$0xff] }
 0x229   : > { %v1743_v28 = vadd.f32 %v1742_v24, %v1234_v18  ;;  %v4077_v18 = vld [vmem:[%s2380_s28 + $0x7b8] sm:$0xff]  ;;  %v1982_v17 = vadd.f32 %v1981_v11, %v1474_v12  ;;  %v1477_v24 = vmul.f32 %v3937_v23, %v712_v8  ;;  %v715_v23 = vld [vmem:[%s2374_s26 + $0xf28] sm:$0xff] }
 0x22a   : > { %v1242_v29 = vmul.f32 %v4077_v18, %v477_v57  ;;  %v4112_v12 = vld [vmem:[%s2380_s28 + $0x7e0] sm:$0xff]  ;;  %v4122_v8 = vld [vmem:[%s2380_s28 + $0x7e8] sm:$0xff] }
 0x22b   : > { %v1744_v32 = vadd.f32 %v1743_v28, %v1235_v27  ;;  %v4084_v27 = vld [vmem:[%s2380_s28 + $0x7c0] sm:$0xff]  ;;  %v1983_v22 = vadd.f32 %v1982_v17, %v1475_v16  ;;  %v1478_v28 = vmul.f32 %v3944_v33, %v713_v1 }
 0x22c   : > { %v1243_v39 = vmul.f32 %v4084_v27, %v478_v63  ;;  %v718_v3 = vld [vmem:[%s2374_s26 + $0xf40] sm:$0xff]  ;;  %v483_v11 = vld [vmem:[%s2374_s26 + $0x7e8] sm:$0xff] }
 0x22d   : > { %v1745_v36 = vadd.f32 %v1744_v32, %v1236_v38  ;;  %v4091_v38 = vld [vmem:[%s2380_s28 + $0x7c8] sm:$0xff]  ;;  %v1984_v30 = vadd.f32 %v1983_v22, %v1476_v20  ;;  %v1479_v32 = vmul.f32 %v3951_v42, %v714_v13  ;;  %v1246_v42 = vmul.f32 %v4105_v55, %v481_v31 }
 0x22e   : > { %v1244_v49 = vmul.f32 %v4091_v38, %v479_v10  ;;  %v719_v57 = vld [vmem:[%s2374_s26 + $0xf48] sm:$0xff]  ;;  %v1248_v17 = vmul.f32 %v4122_v8, %v483_v11  ;;  %v733_v11 = vld [vmem:[%s2374_s26 + $0xfb8] sm:$0xff] }
 0x22f   : > { %v1746_v40 = vadd.f32 %v1745_v36, %v1237_v47  ;;  %v4098_v47 = vld [vmem:[%s2380_s28 + $0x7d0] sm:$0xff]  ;;  %v1985_v34 = vadd.f32 %v1984_v30, %v1477_v24  ;;  %v1480_v36 = vmul.f32 %v3958_v4, %v715_v23  ;;  %v1484_v63 = vmul.f32 %v3986_v25, %v719_v57  ;;  %v723_v25 = vld [vmem:[%s2374_s26 + $0xf68] sm:$0xff] }
 0x230   : > { %v1245_v33 = vmul.f32 %v4098_v47, %v480_v21  ;;  %v721_v24 = vld [vmem:[%s2374_s26 + $0xf58] sm:$0xff]  ;;  %v724_v23 = vld [vmem:[%s2374_s26 + $0xf70] sm:$0xff] }
 0x231   : > { %v1747_v44 = vadd.f32 %v1746_v40, %v1238_v54  ;;  %v716_v54 = vld [vmem:[%s2374_s26 + $0xf30] sm:$0xff]  ;;  %v1986_v43 = vadd.f32 %v1985_v34, %v1478_v28  ;;  %v725_v34 = vld [vmem:[%s2374_s26 + $0xf78] sm:$0xff]  ;;  %v1489_v31 = vmul.f32 %v4021_v5, %v724_v23 }
 0x232   : > { %v1481_v40 = vmul.f32 %v3965_v58, %v716_v54  ;;  %v726_v54 = vld [vmem:[%s2374_s26 + $0xf80] sm:$0xff]  ;;  %v729_v5 = vld [vmem:[%s2374_s26 + $0xf98] sm:$0xff] }
 0x233   : > { %v1748_v48 = vadd.f32 %v1747_v44, %v1239_v62  ;;  %v717_v62 = vld [vmem:[%s2374_s26 + $0xf38] sm:$0xff]  ;;  %v1987_v50 = vadd.f32 %v1986_v43, %v1479_v32  ;;  %v1491_v43 = vmul.f32 %v4035_v26, %v726_v54 }
 0x234   : > { %v1482_v4 = vmul.f32 %v3972_v2, %v717_v62 }
 0x235   : > { %v1749_v52 = vadd.f32 %v1748_v48, %v1240_v9  ;;  %v1247_v9 = vmul.f32 %v4112_v12, %v482_v41  ;;  %v1988_v44 = vadd.f32 %v1987_v50, %v1480_v36  ;;  %v720_v48 = vld [vmem:[%s2374_s26 + $0xf50] sm:$0xff]  ;;  %v1494_v50 = vmul.f32 %v4056_v53, %v729_v5 }
 0x236   : > { %v1485_v22 = vmul.f32 %v3993_v35, %v720_v48  ;;  %v728_v41 = vld [vmem:[%s2374_s26 + $0xf90] sm:$0xff]  ;;  %v1498_v53 = vmul.f32 %v4084_v27, %v733_v11 }
 0x237   : > { %v1750_v56 = vadd.f32 %v1749_v52, %v1241_v19  ;;  %v1483_v19 = vmul.f32 %v3979_v14, %v718_v3  ;;  %v1989_v20 = vadd.f32 %v1988_v44, %v1481_v40  ;;  %v4131_v52 = vld [vmem:[%s2380_s28 + $0x7f0] sm:$0xff]  ;;  %v722_v14 = vld [vmem:[%s2374_s26 + $0xf60] sm:$0xff]  ;;  %v1493_v40 = vmul.f32 %v4049_v46, %v728_v41 }
 0x238   : > { %v1487_v30 = vmul.f32 %v4007_v51, %v722_v14 }
 0x239   : > { %v1751_v60 = vadd.f32 %v1750_v56, %v1242_v29  ;;  %v1990_v1 = vadd.f32 %v1989_v20, %v1482_v4  ;;  %v484_v29 = vld [vmem:[%s2374_s26 + $0x7f0] sm:$0xff]  ;;  %v735_v20 = vld [vmem:[%s2374_s26 + $0xfc8] sm:$0xff] }
 0x23a   : > { %v1249_v13 = vmul.f32 %v4131_v52, %v484_v29 }
 0x23b   : > { %v1752_v0 = vadd.f32 %v1751_v60, %v1243_v39  ;;  %v1991_v10 = vadd.f32 %v1990_v1, %v1483_v19  ;;  %v1486_v39 = vmul.f32 %v4000_v45, %v721_v24  ;;  %v228_v60 = vld [vmem:[#allocation2] sm:$0xff] }
 0x23c   : > { %v734_v19 = vld [vmem:[%s2374_s26 + $0xfc0] sm:$0xff] }
 0x23d   : > { %v1753_v6 = vadd.f32 %v1752_v0, %v1244_v49  ;;  %v1992_v56 = vadd.f32 %v1991_v10, %v1484_v63  ;;  %v1488_v49 = vmul.f32 %v4014_v59, %v723_v25  ;;  %v727_v0 = vld [vmem:[%s2374_s26 + $0xf88] sm:$0xff]  ;;  %v1499_v48 = vmul.f32 %v4091_v38, %v734_v19  ;;  %v738_v24 = vld [vmem:[%s2374_s26 + $0xfe0] sm:$0xff] }
 0x23e   : > { %v1492_v62 = vmul.f32 %v4042_v37, %v727_v0  ;;  %v1500_v63 = vmul.f32 %v4098_v47, %v735_v20  ;;  %v739_v10 = vld [vmem:[%s2374_s26 + $0xfe8] sm:$0xff]  ;;  %v1503_v27 = vmul.f32 %v4122_v8, %v738_v24 }
 0x23f   : > { %v1754_v16 = vadd.f32 %v1753_v6, %v1245_v33  ;;  %v1993_v21 = vadd.f32 %v1992_v56, %v1485_v22  ;;  %v1490_v33 = vmul.f32 %v4028_v15, %v725_v34  ;;  %v730_v15 = vld [vmem:[%s2374_s26 + $0xfa0] sm:$0xff] }
 0x240   : > { %v1495_v26 = vmul.f32 %v4063_v61, %v730_v15 }
 0x241   : > { %v1755_v58 = vadd.f32 %v1754_v16, %v1246_v42  ;;  %v1994_v35 = vadd.f32 %v1993_v21, %v1486_v39  ;;  %v732_v16 = vld [vmem:[%s2374_s26 + $0xfb0] sm:$0xff] }
 0x242   : > { %v1497_v46 = vmul.f32 %v4077_v18, %v732_v16 }
 0x243   : > { %v1756_v2 = vadd.f32 %v1755_v58, %v1247_v9  ;;  %v1995_v45 = vadd.f32 %v1994_v35, %v1487_v30  ;;  %v731_v9 = vld [vmem:[%s2374_s26 + $0xfa8] sm:$0xff] }
 0x244   : > { %v1496_v37 = vmul.f32 %v4070_v7, %v731_v9  ;;  %v737_v7 = vld [vmem:[%s2374_s26 + $0xfd8] sm:$0xff] }
 0x245   : > { %v1757_v28 = vadd.f32 %v1756_v2, %v1248_v17  ;;  %v1996_v36 = vadd.f32 %v1995_v45, %v1488_v49  ;;  %v736_v17 = vld [vmem:[%s2374_s26 + $0xfd0] sm:$0xff]  ;;  %v1502_v18 = vmul.f32 %v4112_v12, %v737_v7 }
 0x246   : > { %v1501_v1 = vmul.f32 %v4105_v55, %v736_v17 }
 0x247   : > { %v1758_v32 = vadd.f32 %v1757_v28, %v1249_v13  ;;  %v1997_v59 = vadd.f32 %v1996_v36, %v1489_v31  ;;  %v1504_v13 = vmul.f32 %v4131_v52, %v739_v10  ;;  %v229_v28 = vld [vmem:[#allocation2 + $0x8] sm:$0xff] }
 0x249   : > { %v2013_v51 = vadd.f32 %v1758_v32, %v228_v60  ;;  %v1998_v42 = vadd.f32 %v1997_v59, %v1490_v33 }
 0x24b   : > { %2015 = vst [vmem:[#allocation2] sm:$0xff] %v2013_v51  ;;  %v1999_v6 = vadd.f32 %v1998_v42, %v1491_v43 }
 0x24d   : > { %v2000_v3 = vadd.f32 %v1999_v6, %v1492_v62 }
 0x24f   : > { %v2001_v4 = vadd.f32 %v2000_v3, %v1493_v40 }
 0x251   : > { %v2002_v44 = vadd.f32 %v2001_v4, %v1494_v50 }
 0x253   : > { %v2003_v57 = vadd.f32 %v2002_v44, %v1495_v26 }
 0x255   : > { %v2004_v58 = vadd.f32 %v2003_v57, %v1496_v37 }
 0x257   : > { %v2005_v61 = vadd.f32 %v2004_v58, %v1497_v46 }
 0x259   : > { %v2006_v2 = vadd.f32 %v2005_v61, %v1498_v53 }
 0x25b   : > { %v2007_v29 = vadd.f32 %v2006_v2, %v1499_v48 }
 0x25d   : > { %v2008_v22 = vadd.f32 %v2007_v29, %v1500_v63 }
 0x25f   : > { %v2009_v14 = vadd.f32 %v2008_v22, %v1501_v1 }
 0x261   : > { %v2010_v38 = vadd.f32 %v2009_v14, %v1502_v18 }
 0x263   : > { %v2011_v39 = vadd.f32 %v2010_v38, %v1503_v27 }
 0x265   : > { %v2012_v56 = vadd.f32 %v2011_v39, %v1504_v13  ;;  %2020 = sbr.rel (%p2122_p5) target bundleno = 762 (0x2fa), region = 44 }
 0x267   : > { %v2014_v47 = vadd.f32 %v2012_v56, %v229_v28 }
 0x269   : > { %2016 = vst [vmem:[#allocation2 + $0x8] sm:$0xff] %v2014_v47 }
 0x26a   : > { %v2021_v55 = vld [vmem:[#allocation2] sm:$0xff]  ;;  %vm2037_vm0 = vcmask 1041409   ;;  %vm2040_vm1 = vcmask 1041408   ;;  %v2045_v33 = vstv %s2044_s17  ;;  %vm2049_vm2 = vcmask 1024  }
 0x26b   : > { %v2023_v30 = vrot.slane %v2021_v55, 4 }
 0x26d   : > { %v2024_v21 = vadd.f32 %v2023_v30, %v2021_v55 }
 0x26f   : > { %v2025_v49 = vrot.slane %v2024_v21, 2 }
 0x270   : > { %v2022_v25 = vld [vmem:[#allocation2 + $0x8] sm:$0xff] }
 0x271   : > { %v2029_v12 = vrot.slane %v2022_v25, 4  ;;  %v2026_v32 = vadd.f32 %v2025_v49, %v2024_v21 }
 0x273   : > { %v2030_v23 = vadd.f32 %v2029_v12, %v2022_v25  ;;  %v2027_v52 = vrot.slane %v2026_v32, 1 }
 0x275   : > { %v2031_v8 = vrot.slane %v2030_v23, 2  ;;  %v2028_v34 = vadd.f32 %v2027_v52, %v2026_v32 }
 0x277   : > { %v2032_v35 = vadd.f32 %v2031_v8, %v2030_v23 }
 0x279   : > { %v2033_v60 = vrot.slane %v2032_v35, 1 }
 0x27b   : > { %v2034_v31 = vadd.f32 %v2033_v60, %v2032_v35 }
 0x27d   : > { %v2038_v45 = vsel %vm2037_vm0, %v2034_v31, %v2028_v34 }
 0x27e   : > { %v2041_v54 = vsel %vm2040_vm1, %v2038_v45, 0.0 }
 0x27f   : > { %2042 = vadd.xlane.f32.xlu0 %v2041_v54 }
 0x2f2   : > { %v2043_v36 = vpop.xlane.xlu0 %2042 }
 0x2f3   : > { %v2046_v51 = vadd.f32 %v2045_v33, %v2043_v36 }
 0x2f5   : > { %v2047_v0 = vmax.f32 %v2046_v51, 0.8 }
 0x2f7   : > { %v2048_v43 = vmin.f32 %v2047_v0, 1.9 }
 0x2f9   : > { %2050 = vst.msk [vmem:[%s4192_s3] sm:$0x3] %vm2049_vm2, %v2048_v43 }
 0x2fa PF: > { %p17_p6 = scmp.ge.s32.totalorder %s2305_s18, 6   ;;  %s4195_s14 = smov %s2241_s15 }
 0x2fb   : > { %s4196_s15 = smov %s2245_s16  ;;  %s4197_s16 = smov %s2315_s21 }
 0x2fc   : > { %s4198_s17 = smov %s2305_s18  ;;  %19 = sbr.rel (!%p17_p6) target bundleno = 7 (0x7), region = 90 }
 0x301   :  { %2062 = vsyncpa [#allocation6], 1 }
 0x302   :  { %2064 = vsyncpa [#allocation6 + $0x1], 1 }
 0x303   :  { %2065 = vsyncpa [#allocation8], 1 }
 0x304   :  { %2067 = vsyncpa [#allocation8 + $0x1], 1 }

</bundles_post_ra>
